<compile_context>
chip_gen: v7x
topology: tpu7x:2x2x1
jax: 0.10.0
libtpu: 0.0.40
codegen_flags: <defaults>
</compile_context>

<pallas_src>
import functools

import jax
import jax.numpy as jnp
from jax.experimental import pallas as pl
from jax.experimental.pallas import tpu as pltpu


# ----------------------------------------------------------------------------
# Kernels
# ----------------------------------------------------------------------------
def _in_lin_kernel(x_ref, w_ref, b_ref, o_ref):
    """Pointwise input projection, one batch element per grid step."""
    w = w_ref[...]
    b = b_ref[...]
    for t in range(x_ref.shape[0]):                       # static, small unroll
        o_ref[t] = jnp.dot(x_ref[t], w, preferred_element_type=jnp.float32) + b


def _tnorm_stats_kernel(h_ref, o_ref):
    """Per-(node, channel) mean / biased var over (batch, time)."""
    x = h_ref[...]                                        # (B, T, bn, C)
    mean = jnp.mean(jnp.mean(x, axis=0), axis=0)          # (bn, C)
    diff = x - mean[None, None, :, :]
    var = jnp.mean(jnp.mean(diff * diff, axis=0), axis=0)
    o_ref[0] = mean
    o_ref[1] = var


def _layer_kernel(h_ref, tstat_ref, sg_ref, sb_ref, tg_ref, tb_ref,
                  wfg_ref, bfg_ref, wrs_ref, brs_ref, skip_in_ref,
                  h_out_ref, skip_out_ref,
                  *, k, dil, t_out, c_tcn, c_gcn, use_snorm, use_tnorm, mm_dtype):
    """One fused GWNet layer for one batch element (block = (T, N, C))."""
    h = h_ref[...]                                        # (T, N, C), C == c_tcn
    T, N, C = h.shape

    # --- torch.cat([x, snorm(x), tnorm(x)], dim=1), kept as separate vreg groups ---
    feats = [h]
    if use_snorm:                                         # stats over the node axis
        mean = jnp.mean(h, axis=1, keepdims=True)
        var = jnp.sum((h - mean) ** 2, axis=1, keepdims=True) / (N - 1)   # unbiased
        sn = (h - mean) * jax.lax.rsqrt(var + 1e-5)
        sn = sn * sg_ref[...][None, :, :] + sb_ref[...][None, :, :]
        feats.append(sn)
    if use_tnorm:                                         # stats over (batch, time): prepass
        tm = tstat_ref[0][None, :, :]                     # (1, N, C)
        tv = tstat_ref[1][None, :, :]
        tn_ = (h - tm) * jax.lax.rsqrt(tv + 1e-5)
        tn_ = tn_ * tg_ref[...][None, :, :] + tb_ref[...][None, :, :]
        feats.append(tn_)
    n_groups = len(feats)

    wfg = wfg_ref[...]                                    # (k, n_groups*C, 2*c_gcn)
    wrs = wrs_ref[...]                                    # (c_gcn, c_tcn + skip)
    # hoisted broadcasts (do not re-broadcast inside the loop)
    bfg = jnp.broadcast_to(bfg_ref[...], (N, 2 * c_gcn)).astype(jnp.float32)
    brs = jnp.broadcast_to(brs_ref[...], (N, wrs.shape[1])).astype(jnp.float32)

    # --- causal dilated gated TCN + fused residual/skip conv, per output step ---
    for t in range(t_out):                                # static unroll
        fg = bfg                                          # filter|gate accumulator (N, 2G)
        for j in range(k):
            ti = t + j * dil                              # causal dilated tap
            for g in range(n_groups):                     # concat == sum of split matmuls
                xs = feats[g][ti]                         # (N, C), leading-axis slice
                w = wfg[j, g * C:(g + 1) * C, :]          # (C, 2G)
                if mm_dtype != jnp.float32:
                    xs = xs.astype(mm_dtype)
                fg = fg + jnp.dot(xs, w, preferred_element_type=jnp.float32)
        h_tcn = jnp.tanh(fg[:, :c_gcn]) * jax.nn.sigmoid(fg[:, c_gcn:])   # (N, G)
        ht = h_tcn.astype(mm_dtype) if mm_dtype != jnp.float32 else h_tcn
        rs = jnp.dot(ht, wrs, preferred_element_type=jnp.float32) + brs   # (N, tcn+skip)
        # residual = pre-concat x, last t_out steps (aligned with output step t)
        h_out_ref[t] = rs[:, :c_tcn] + h[T - t_out + t]
        if t == t_out - 1:                                # only the last step's skip is used
            skip_out_ref[...] = skip_in_ref[...] + rs[:, c_tcn:]


def _head_kernel(s_ref, w1_ref, b1_ref, w2_ref, b2_ref, o_ref):
    """ReLU -> Linear2d -> ReLU -> Linear2d on the accumulated skip sum."""
    h = jnp.maximum(s_ref[...], 0.0)
    h = jnp.dot(h, w1_ref[...], preferred_element_type=jnp.float32) + b1_ref[...]
    h = jnp.maximum(h, 0.0)
    o_ref[...] = jnp.dot(h, w2_ref[...], preferred_element_type=jnp.float32) + b2_ref[...]


# ----------------------------------------------------------------------------
# Wrappers
# ----------------------------------------------------------------------------
def in_linear(x, w, b):
    B, T, N, Cin = x.shape
    Cout = w.shape[1]
    return pl.pallas_call(
        _in_lin_kernel,
        out_shape=jax.ShapeDtypeStruct((B, T, N, Cout), jnp.float32),
        grid=(B,),
        in_specs=[
            pl.BlockSpec((None, T, N, Cin), lambda bb: (bb, 0, 0, 0)),
            pl.BlockSpec((Cin, Cout), lambda bb: (0, 0)),
            pl.BlockSpec((1, Cout), lambda bb: (0, 0)),
        ],
        out_specs=pl.BlockSpec((None, T, N, Cout), lambda bb: (bb, 0, 0, 0)),
        compiler_params=pltpu.CompilerParams(dimension_semantics=("parallel",)),
    )(x, w, b.reshape(1, Cout))


def tnorm_stats(h):
    """(2, N, C) = [mean; biased var] over (batch, time), tiled over nodes."""
    B, T, N, C = h.shape
    bn = N
    if N % 8 == 0 and N > 8:
        bn = max(8, ((N // 2) // 8) * 8)        # >=2 blocks -> v7x TC parallelism
    while bn > 8 and bn % 8 == 0 and B * T * bn * C * 4 > (4 << 20):
        bn = max(8, ((bn // 2) // 8) * 8)       # bound VMEM footprint on 64 MiB parts
    return pl.pallas_call(
        _tnorm_stats_kernel,
        out_shape=jax.ShapeDtypeStruct((2, N, C), jnp.float32),
        grid=(pl.cdiv(N, bn),),
        in_specs=[pl.BlockSpec((B, T, bn, C), lambda i: (0, 0, i, 0))],
        out_specs=pl.BlockSpec((2, bn, C), lambda i: (0, i, 0)),
        compiler_params=pltpu.CompilerParams(dimension_semantics=("parallel",)),
    )(h)


def st_layer(h, tstat, fused, skip_acc, *, k, dil, cfg):
    B, T, N, C = h.shape
    t_out = T - dil * (k - 1)
    c_tcn = cfg["tcn_in_dim"]
    c_gcn = cfg["gcn_in_dim"]
    c_skip = cfg["skip_dim"]
    sg, sb, tg, tb, wfg, bfg, wrs, brs = fused
    gin = wfg.shape[1]
    mm_dtype = jnp.bfloat16 if cfg.get("bf16_matmul", False) else jnp.float32
    kernel = functools.partial(
        _layer_kernel, k=k, dil=dil, t_out=t_out, c_tcn=c_tcn, c_gcn=c_gcn,
        use_snorm=cfg["snorm"], use_tnorm=cfg["tnorm"], mm_dtype=mm_dtype)
    h_out, skip_out = pl.pallas_call(
        kernel,
        out_shape=(jax.ShapeDtypeStruct((B, t_out, N, c_tcn), jnp.float32),
                   jax.ShapeDtypeStruct((B, N, c_skip), jnp.float32)),
        grid=(B,),
        in_specs=[
            pl.BlockSpec((None, T, N, C), lambda bb: (bb, 0, 0, 0)),      # h
            pl.BlockSpec((2, N, C), lambda bb: (0, 0, 0)),                # tnorm stats
            pl.BlockSpec((1, C), lambda bb: (0, 0)),                      # snorm gamma
            pl.BlockSpec((1, C), lambda bb: (0, 0)),                      # snorm beta
            pl.BlockSpec((N, C), lambda bb: (0, 0)),                      # tnorm gamma
            pl.BlockSpec((N, C), lambda bb: (0, 0)),                      # tnorm beta
            pl.BlockSpec((k, gin, 2 * c_gcn), lambda bb: (0, 0, 0)),      # fused filt|gate W
            pl.BlockSpec((1, 2 * c_gcn), lambda bb: (0, 0)),              # fused filt|gate b
            pl.BlockSpec((c_gcn, c_tcn + c_skip), lambda bb: (0, 0)),     # fused res|skip W
            pl.BlockSpec((1, c_tcn + c_skip), lambda bb: (0, 0)),         # fused res|skip b
            pl.BlockSpec((None, N, c_skip), lambda bb: (bb, 0, 0)),       # skip accumulator
        ],
        out_specs=(
            pl.BlockSpec((None, t_out, N, c_tcn), lambda bb: (bb, 0, 0, 0)),
            pl.BlockSpec((None, N, c_skip), lambda bb: (bb, 0, 0)),
        ),
        input_output_aliases={10: 1},                     # skip accumulator updated in place
        compiler_params=pltpu.CompilerParams(dimension_semantics=("parallel",)),
    )(h, tstat, sg, sb, tg, tb, wfg, bfg, wrs, brs, skip_acc)
    return h_out, skip_out


def output_head(skip_acc, w1, b1, w2, b2):
    B, N, S = skip_acc.shape
    E = w1.shape[1]
    Q = w2.shape[1]
    return pl.pallas_call(
        _head_kernel,
        out_shape=jax.ShapeDtypeStruct((B, N, Q), jnp.float32),
        grid=(B,),
        in_specs=[
            pl.BlockSpec((None, N, S), lambda bb: (bb, 0, 0)),
            pl.BlockSpec((S, E), lambda bb: (0, 0)),
            pl.BlockSpec((1, E), lambda bb: (0, 0)),
            pl.BlockSpec((E, Q), lambda bb: (0, 0)),
            pl.BlockSpec((1, Q), lambda bb: (0, 0)),
        ],
        out_specs=pl.BlockSpec((None, N, Q), lambda bb: (bb, 0, 0)),
        compiler_params=pltpu.CompilerParams(dimension_semantics=("parallel",)),
    )(skip_acc, w1, b1.reshape(1, E), w2, b2.reshape(1, Q))


# ----------------------------------------------------------------------------
# Parameters (module-faithful structure; weights stored as (Cin, Cout) matmuls,
# conv taps as leading axis; fused views are built once per layer at trace time)
# ----------------------------------------------------------------------------
def init_params(key, cfg):
    c_in = cfg["in_dim"]
    tcn = cfg["tcn_in_dim"]
    gcn = cfg["gcn_in_dim"]
    skip = cfg["skip_dim"]
    end = cfg["end_dim"]
    q = cfg["out_len"]
    n = cfg["n_series"]
    k = cfg["kernel_size"]
    n_layers = cfg["n_layers"]
    # concat order along input channels: [x | snorm(x) | tnorm(x)]
    cin_cat = (1 + int(cfg["snorm"]) + int(cfg["tnorm"])) * tcn

    keys = iter(jax.random.split(key, 64))

    def rnd(shape):
        return jax.random.normal(next(keys), shape, jnp.float32) * 0.1

    params = {
        "in_lin": (rnd((c_in, tcn)), rnd((tcn,))),
        "layers": [],
        "head": (rnd((skip, end)), rnd((end,)), rnd((end, q)), rnd((q,))),
    }
    for _ in range(n_layers):
        params["layers"].append(dict(
            snorm_g=jnp.ones((tcn,), jnp.float32),
            snorm_b=jnp.zeros((tcn,), jnp.float32),
            tnorm_g=jnp.ones((n, tcn), jnp.float32),
            tnorm_b=jnp.zeros((n, tcn), jnp.float32),
            wf=rnd((k, cin_cat, gcn)), bf=rnd((gcn,)),
            wg=rnd((k, cin_cat, gcn)), bg=rnd((gcn,)),
            w_res=rnd((gcn, tcn)), b_res=rnd((tcn,)),
            w_skip=rnd((gcn, skip)), b_skip=rnd((skip,)),
        ))
    return params


def _fuse_layer_weights(p, cfg):
    """Exact-identity weight fusion: [filter|gate] on the output axis, [res|skip] likewise."""
    mm_dtype = jnp.bfloat16 if cfg.get("bf16_matmul", False) else jnp.float32
    wfg = jnp.concatenate([p["wf"], p["wg"]], axis=-1)                    # (k, GIN, 2*gcn)
    bfg = jnp.concatenate([p["bf"], p["bg"]], axis=-1).reshape(1, -1)
    wrs = jnp.concatenate([p["w_res"], p["w_skip"]], axis=-1)             # (gcn, tcn+skip)
    brs = jnp.concatenate([p["b_res"], p["b_skip"]], axis=-1).reshape(1, -1)
    if mm_dtype != jnp.float32:
        wfg = wfg.astype(mm_dtype)
        wrs = wrs.astype(mm_dtype)
    sg = p["snorm_g"].reshape(1, -1)
    sb = p["snorm_b"].reshape(1, -1)
    return sg, sb, p["tnorm_g"], p["tnorm_b"], wfg, bfg, wrs, brs


# ----------------------------------------------------------------------------
# STNorm forward
# ----------------------------------------------------------------------------
def stnorm_forward(x, params, cfg):
    """x: (B, P, N, C)  ->  output: (B, Q, N)."""
    B, P, N, _ = x.shape
    k = cfg["kernel_size"]
    n_layers = cfg["n_layers"]
    df = cfg["dilation_factor"]
    dils = list(df) if isinstance(df, (list, tuple)) else [df ** l for l in range(n_layers)]
    receptive = 1 + sum(d * (k - 1) for d in dils)
    tcn = cfg["tcn_in_dim"]
    skip_dim = cfg["skip_dim"]
    if cfg["snorm"]:
        assert N >= 2, "SNorm uses unbiased variance over series; needs n_series >= 2."

    # (B, P, N, C) is already time-major / channels-last: just left-pad the time axis.
    h = x.astype(jnp.float32)
    if P < receptive:
        h = jnp.pad(h, ((0, 0), (receptive - P, 0), (0, 0), (0, 0)))

    w_in, b_in = params["in_lin"]
    h = in_linear(h, w_in, b_in)                            # (B, T, N, tcn)

    skip_acc = jnp.zeros((B, N, skip_dim), jnp.float32)
    for l in range(n_layers):
        p = params["layers"][l]
        if cfg["tnorm"]:
            tstat = tnorm_stats(h)                          # (2, N, tcn) batch stats
        else:
            tstat = jnp.zeros((2, N, tcn), jnp.float32)
        fused = _fuse_layer_weights(p, cfg)
        h, skip_acc = st_layer(h, tstat, fused, skip_acc, k=k, dil=dils[l], cfg=cfg)

    # PyTorch asserts the last skip's temporal dim == 1 (only last steps are summed).
    assert h.shape[1] == 1, "Temporal dimension must be equal to 1."

    w1, b1, w2, b2 = params["head"]
    out = output_head(skip_acc, w1, b1, w2, b2)             # (B, N, Q)
    return jnp.transpose(out, (0, 2, 1))                    # (B, Q, N)


# ----------------------------------------------------------------------------
if __name__ == "__main__":
    cfg = dict(
        in_dim=3, skip_dim=8, end_dim=16, out_len=4, n_series=8,
        n_layers=2, tcn_in_dim=8, gcn_in_dim=8, kernel_size=2,
        dilation_factor=2, snorm=True, tnorm=True, bn=False,
        bf16_matmul=False,   # set True on v6e/v7x: bf16 MXU inputs, f32 accumulate/elementwise
    )
    key = jax.random.PRNGKey(0)
    pkey, xkey = jax.random.split(key)
    params = init_params(pkey, cfg)

    B, P, N, C = 2, 4, cfg["n_series"], cfg["in_dim"]   # P == receptive field (=> final T == 1)
    x = jax.random.normal(xkey, (B, P, N, C), jnp.float32)
    # As (adjacency matrices) unused: gcn=False in this GWNetLayer config.

    fwd = jax.jit(functools.partial(stnorm_forward, cfg=cfg))
    out = jax.block_until_ready(fwd(x, params))
    assert out.shape == (B, cfg["out_len"], N)
    assert bool(jnp.all(jnp.isfinite(out)))
    print("KERNEL_OK")
</pallas_src>

<mosaic_0001>
module attributes {stable_mosaic.version = 11 : i64} {
  func.func @_tnorm_stats_kernel(%arg0: i32, %arg1: memref<2x4x8x8xf32, #tpu.memory_space<vmem>>, %arg2: memref<2x8x8xf32, #tpu.memory_space<vmem>>) attributes {dimension_semantics = [#tpu.dimension_semantics<parallel>], iteration_bounds = array<i64: 1>, scalar_prefetch = 0 : i64, scratch_operands = 0 : i64, tpu.core_type = #tpu.core_type<tc>, window_params = [{transform_indices = @transform_0, window_bounds = array<i64: 2, 4, 8, 8>}, {transform_indices = @transform_1, window_bounds = array<i64: 2, 8, 8>}]} {
    %c0 = arith.constant 0 : index
    %c0_0 = arith.constant 0 : index
    %c0_1 = arith.constant 0 : index
    %c0_2 = arith.constant 0 : index
    %0 = vector.load %arg1[%c0, %c0_0, %c0_1, %c0_2] : memref<2x4x8x8xf32, #tpu.memory_space<vmem>>, vector<2x4x8x8xf32>
    %cst = arith.constant dense<0.000000e+00> : vector<4x8x8xf32>
    %1 = vector.multi_reduction <add>, %0, %cst [0] : vector<2x4x8x8xf32> to vector<4x8x8xf32>
    %cst_3 = arith.constant 2.000000e+00 : f32
    %2 = vector.broadcast %cst_3 : f32 to vector<4x8x8xf32>
    %3 = arith.divf %1, %2 : vector<4x8x8xf32>
    %cst_4 = arith.constant dense<0.000000e+00> : vector<8x8xf32>
    %4 = vector.multi_reduction <add>, %3, %cst_4 [0] : vector<4x8x8xf32> to vector<8x8xf32>
    %cst_5 = arith.constant 4.000000e+00 : f32
    %5 = vector.broadcast %cst_5 : f32 to vector<8x8xf32>
    %6 = arith.divf %4, %5 : vector<8x8xf32>
    %7 = vector.shape_cast %6 : vector<8x8xf32> to vector<1x1x8x8xf32>
    %8 = vector.broadcast %7 : vector<1x1x8x8xf32> to vector<2x4x8x8xf32>
    %9 = arith.subf %0, %8 : vector<2x4x8x8xf32>
    %10 = arith.mulf %9, %9 : vector<2x4x8x8xf32>
    %cst_6 = arith.constant dense<0.000000e+00> : vector<4x8x8xf32>
    %11 = vector.multi_reduction <add>, %10, %cst_6 [0] : vector<2x4x8x8xf32> to vector<4x8x8xf32>
    %cst_7 = arith.constant 2.000000e+00 : f32
    %12 = vector.broadcast %cst_7 : f32 to vector<4x8x8xf32>
    %13 = arith.divf %11, %12 : vector<4x8x8xf32>
    %cst_8 = arith.constant dense<0.000000e+00> : vector<8x8xf32>
    %14 = vector.multi_reduction <add>, %13, %cst_8 [0] : vector<4x8x8xf32> to vector<8x8xf32>
    %cst_9 = arith.constant 4.000000e+00 : f32
    %15 = vector.broadcast %cst_9 : f32 to vector<8x8xf32>
    %16 = arith.divf %14, %15 : vector<8x8xf32>
    %c0_10 = arith.constant 0 : index
    %c0_11 = arith.constant 0 : index
    %c0_12 = arith.constant 0 : index
    %17 = vector.load %arg2[%c0_10, %c0_11, %c0_12] : memref<2x8x8xf32, #tpu.memory_space<vmem>>, vector<1x8x8xf32>
    %18 = vector.shape_cast %17 : vector<1x8x8xf32> to vector<8x8xf32>
    %19 = vector.shape_cast %6 : vector<8x8xf32> to vector<1x8x8xf32>
    tpu.vector_store %arg2[%c0_10, %c0_11, %c0_12], %19 {strides = array<i32>} : memref<2x8x8xf32, #tpu.memory_space<vmem>>, vector<1x8x8xf32>,
    %c1 = arith.constant 1 : index
    %c0_13 = arith.constant 0 : index
    %c0_14 = arith.constant 0 : index
    %20 = vector.load %arg2[%c1, %c0_13, %c0_14] : memref<2x8x8xf32, #tpu.memory_space<vmem>>, vector<1x8x8xf32>
    %21 = vector.shape_cast %20 : vector<1x8x8xf32> to vector<8x8xf32>
    %22 = vector.shape_cast %16 : vector<8x8xf32> to vector<1x8x8xf32>
    tpu.vector_store %arg2[%c1, %c0_13, %c0_14], %22 {strides = array<i32>} : memref<2x8x8xf32, #tpu.memory_space<vmem>>, vector<1x8x8xf32>,
    return
  }
  func.func @transform_0(%arg0: i32) -> (i32, i32, i32, i32) {
    %c0_i32 = arith.constant 0 : i32
    %c0_i32_0 = arith.constant 0 : i32
    %c0_i32_1 = arith.constant 0 : i32
    %c0_i32_2 = arith.constant 0 : i32
    return %c0_i32, %c0_i32_0, %arg0, %c0_i32_1 : i32, i32, i32, i32
  }
  func.func @transform_1(%arg0: i32) -> (i32, i32, i32) {
    %c0_i32 = arith.constant 0 : i32
    %c0_i32_0 = arith.constant 0 : i32
    %c0_i32_1 = arith.constant 0 : i32
    return %c0_i32, %arg0, %c0_i32_0 : i32, i32, i32
  }
}

module attributes {stable_mosaic.version = 11 : i64} {
  func.func @_in_lin_kernel(%arg0: i32, %arg1: memref<1x4x8x3xf32, #tpu.memory_space<vmem>>, %arg2: memref<3x8xf32, #tpu.memory_space<vmem>>, %arg3: memref<1x8xf32, #tpu.memory_space<vmem>>, %arg4: memref<1x4x8x8xf32, #tpu.memory_space<vmem>>) attributes {dimension_semantics = [#tpu.dimension_semantics<parallel>], iteration_bounds = array<i64: 2>, scalar_prefetch = 0 : i64, scratch_operands = 0 : i64, tpu.core_type = #tpu.core_type<tc>, window_params = [{transform_indices = @transform_0, window_bounds = array<i64: 1, 4, 8, 3>}, {pipeline_mode = #tpu.pipeline_mode<synchronous>, transform_indices = @transform_1, window_bounds = array<i64: 3, 8>}, {pipeline_mode = #tpu.pipeline_mode<synchronous>, transform_indices = @transform_2, window_bounds = array<i64: 1, 8>}, {transform_indices = @transform_3, window_bounds = array<i64: 1, 4, 8, 8>}]} {
    %c0 = arith.constant 0 : index
    %c0_0 = arith.constant 0 : index
    %0 = vector.load %arg2[%c0, %c0_0] : memref<3x8xf32, #tpu.memory_space<vmem>>, vector<3x8xf32>
    %c0_1 = arith.constant 0 : index
    %c0_2 = arith.constant 0 : index
    %1 = vector.load %arg3[%c0_1, %c0_2] : memref<1x8xf32, #tpu.memory_space<vmem>>, vector<1x8xf32>
    %c0_3 = arith.constant 0 : index
    %c0_4 = arith.constant 0 : index
    %c0_5 = arith.constant 0 : index
    %c0_6 = arith.constant 0 : index
    %2 = vector.load %arg1[%c0_3, %c0_4, %c0_5, %c0_6] : memref<1x4x8x3xf32, #tpu.memory_space<vmem>>, vector<1x1x8x3xf32>
    %3 = vector.shape_cast %2 : vector<1x1x8x3xf32> to vector<8x3xf32>
    %cst = arith.constant dense<0.000000e+00> : vector<8x8xf32>
    %4 = tpu.matmul %3, %0, %cst {dimension_numbers = #tpu.dot_dimension_numbers<[1], [0], [0], [1], [0, 0, 1, 1], [], []>} : vector<8x3xf32>, vector<3x8xf32>, vector<8x8xf32> -> vector<8x8xf32>
    %5 = vector.broadcast %1 : vector<1x8xf32> to vector<8x8xf32>
    %6 = arith.addf %4, %5 : vector<8x8xf32>
    %c0_7 = arith.constant 0 : index
    %c0_8 = arith.constant 0 : index
    %c0_9 = arith.constant 0 : index
    %c0_10 = arith.constant 0 : index
    %7 = vector.load %arg4[%c0_7, %c0_8, %c0_9, %c0_10] : memref<1x4x8x8xf32, #tpu.memory_space<vmem>>, vector<1x1x8x8xf32>
    %8 = vector.shape_cast %7 : vector<1x1x8x8xf32> to vector<8x8xf32>
    %9 = vector.shape_cast %6 : vector<8x8xf32> to vector<1x1x8x8xf32>
    tpu.vector_store %arg4[%c0_7, %c0_8, %c0_9, %c0_10], %9 {strides = array<i32>} : memref<1x4x8x8xf32, #tpu.memory_space<vmem>>, vector<1x1x8x8xf32>,
    %c0_11 = arith.constant 0 : index
    %c1 = arith.constant 1 : index
    %c0_12 = arith.constant 0 : index
    %c0_13 = arith.constant 0 : index
    %10 = vector.load %arg1[%c0_11, %c1, %c0_12, %c0_13] : memref<1x4x8x3xf32, #tpu.memory_space<vmem>>, vector<1x1x8x3xf32>
    %11 = vector.shape_cast %10 : vector<1x1x8x3xf32> to vector<8x3xf32>
    %cst_14 = arith.constant dense<0.000000e+00> : vector<8x8xf32>
    %12 = tpu.matmul %11, %0, %cst_14 {dimension_numbers = #tpu.dot_dimension_numbers<[1], [0], [0], [1], [0, 0, 1, 1], [], []>} : vector<8x3xf32>, vector<3x8xf32>, vector<8x8xf32> -> vector<8x8xf32>
    %13 = vector.broadcast %1 : vector<1x8xf32> to vector<8x8xf32>
    %14 = arith.addf %12, %13 : vector<8x8xf32>
    %c0_15 = arith.constant 0 : index
    %c1_16 = arith.constant 1 : index
    %c0_17 = arith.constant 0 : index
    %c0_18 = arith.constant 0 : index
    %15 = vector.load %arg4[%c0_15, %c1_16, %c0_17, %c0_18] : memref<1x4x8x8xf32, #tpu.memory_space<vmem>>, vector<1x1x8x8xf32>
    %16 = vector.shape_cast %15 : vector<1x1x8x8xf32> to vector<8x8xf32>
    %17 = vector.shape_cast %14 : vector<8x8xf32> to vector<1x1x8x8xf32>
    tpu.vector_store %arg4[%c0_15, %c1_16, %c0_17, %c0_18], %17 {strides = array<i32>} : memref<1x4x8x8xf32, #tpu.memory_space<vmem>>, vector<1x1x8x8xf32>,
    %c0_19 = arith.constant 0 : index
    %c2 = arith.constant 2 : index
    %c0_20 = arith.constant 0 : index
    %c0_21 = arith.constant 0 : index
    %18 = vector.load %arg1[%c0_19, %c2, %c0_20, %c0_21] : memref<1x4x8x3xf32, #tpu.memory_space<vmem>>, vector<1x1x8x3xf32>
    %19 = vector.shape_cast %18 : vector<1x1x8x3xf32> to vector<8x3xf32>
    %cst_22 = arith.constant dense<0.000000e+00> : vector<8x8xf32>
    %20 = tpu.matmul %19, %0, %cst_22 {dimension_numbers = #tpu.dot_dimension_numbers<[1], [0], [0], [1], [0, 0, 1, 1], [], []>} : vector<8x3xf32>, vector<3x8xf32>, vector<8x8xf32> -> vector<8x8xf32>
    %21 = vector.broadcast %1 : vector<1x8xf32> to vector<8x8xf32>
    %22 = arith.addf %20, %21 : vector<8x8xf32>
    %c0_23 = arith.constant 0 : index
    %c2_24 = arith.constant 2 : index
    %c0_25 = arith.constant 0 : index
    %c0_26 = arith.constant 0 : index
    %23 = vector.load %arg4[%c0_23, %c2_24, %c0_25, %c0_26] : memref<1x4x8x8xf32, #tpu.memory_space<vmem>>, vector<1x1x8x8xf32>
    %24 = vector.shape_cast %23 : vector<1x1x8x8xf32> to vector<8x8xf32>
    %25 = vector.shape_cast %22 : vector<8x8xf32> to vector<1x1x8x8xf32>
    tpu.vector_store %arg4[%c0_23, %c2_24, %c0_25, %c0_26], %25 {strides = array<i32>} : memref<1x4x8x8xf32, #tpu.memory_space<vmem>>, vector<1x1x8x8xf32>,
    %c0_27 = arith.constant 0 : index
    %c3 = arith.constant 3 : index
    %c0_28 = arith.constant 0 : index
    %c0_29 = arith.constant 0 : index
    %26 = vector.load %arg1[%c0_27, %c3, %c0_28, %c0_29] : memref<1x4x8x3xf32, #tpu.memory_space<vmem>>, vector<1x1x8x3xf32>
    %27 = vector.shape_cast %26 : vector<1x1x8x3xf32> to vector<8x3xf32>
    %cst_30 = arith.constant dense<0.000000e+00> : vector<8x8xf32>
    %28 = tpu.matmul %27, %0, %cst_30 {dimension_numbers = #tpu.dot_dimension_numbers<[1], [0], [0], [1], [0, 0, 1, 1], [], []>} : vector<8x3xf32>, vector<3x8xf32>, vector<8x8xf32> -> vector<8x8xf32>
    %29 = vector.broadcast %1 : vector<1x8xf32> to vector<8x8xf32>
    %30 = arith.addf %28, %29 : vector<8x8xf32>
    %c0_31 = arith.constant 0 : index
    %c3_32 = arith.constant 3 : index
    %c0_33 = arith.constant 0 : index
    %c0_34 = arith.constant 0 : index
    %31 = vector.load %arg4[%c0_31, %c3_32, %c0_33, %c0_34] : memref<1x4x8x8xf32, #tpu.memory_space<vmem>>, vector<1x1x8x8xf32>
    %32 = vector.shape_cast %31 : vector<1x1x8x8xf32> to vector<8x8xf32>
    %33 = vector.shape_cast %30 : vector<8x8xf32> to vector<1x1x8x8xf32>
    tpu.vector_store %arg4[%c0_31, %c3_32, %c0_33, %c0_34], %33 {strides = array<i32>} : memref<1x4x8x8xf32, #tpu.memory_space<vmem>>, vector<1x1x8x8xf32>,
    return
  }
  func.func @transform_0(%arg0: i32) -> (i32, i32, i32, i32) {
    %c0_i32 = arith.constant 0 : i32
    %c0_i32_0 = arith.constant 0 : i32
    %c0_i32_1 = arith.constant 0 : i32
    %c0_i32_2 = arith.constant 0 : i32
    return %arg0, %c0_i32, %c0_i32_0, %c0_i32_1 : i32, i32, i32, i32
  }
  func.func @transform_1(%arg0: i32) -> (i32, i32) {
    %c0_i32 = arith.constant 0 : i32
    %c0_i32_0 = arith.constant 0 : i32
    %c0_i32_1 = arith.constant 0 : i32
    return %c0_i32, %c0_i32_0 : i32, i32
  }
  func.func @transform_2(%arg0: i32) -> (i32, i32) {
    %c0_i32 = arith.constant 0 : i32
    %c0_i32_0 = arith.constant 0 : i32
    %c0_i32_1 = arith.constant 0 : i32
    return %c0_i32, %c0_i32_0 : i32, i32
  }
  func.func @transform_3(%arg0: i32) -> (i32, i32, i32, i32) {
    %c0_i32 = arith.constant 0 : i32
    %c0_i32_0 = arith.constant 0 : i32
    %c0_i32_1 = arith.constant 0 : i32
    %c0_i32_2 = arith.constant 0 : i32
    return %arg0, %c0_i32, %c0_i32_0, %c0_i32_1 : i32, i32, i32, i32
  }
}

module attributes {stable_mosaic.version = 11 : i64} {
  func.func @_layer_kernel(%arg0: i32, %arg1: memref<1x4x8x8xf32, #tpu.memory_space<vmem>>, %arg2: memref<2x8x8xf32, #tpu.memory_space<vmem>>, %arg3: memref<1x8xf32, #tpu.memory_space<vmem>>, %arg4: memref<1x8xf32, #tpu.memory_space<vmem>>, %arg5: memref<8x8xf32, #tpu.memory_space<vmem>>, %arg6: memref<8x8xf32, #tpu.memory_space<vmem>>, %arg7: memref<2x24x16xf32, #tpu.memory_space<vmem>>, %arg8: memref<1x16xf32, #tpu.memory_space<vmem>>, %arg9: memref<8x16xf32, #tpu.memory_space<vmem>>, %arg10: memref<1x16xf32, #tpu.memory_space<vmem>>, %arg11: memref<1x8x8xf32, #tpu.memory_space<vmem>>, %arg12: memref<1x3x8x8xf32, #tpu.memory_space<vmem>>, %arg13: memref<1x8x8xf32, #tpu.memory_space<vmem>>) attributes {dimension_semantics = [#tpu.dimension_semantics<parallel>], iteration_bounds = array<i64: 2>, scalar_prefetch = 0 : i64, scratch_operands = 0 : i64, tpu.core_type = #tpu.core_type<tc>, window_params = [{transform_indices = @transform_0, window_bounds = array<i64: 1, 4, 8, 8>}, {pipeline_mode = #tpu.pipeline_mode<synchronous>, transform_indices = @transform_1, window_bounds = array<i64: 2, 8, 8>}, {pipeline_mode = #tpu.pipeline_mode<synchronous>, transform_indices = @transform_2, window_bounds = array<i64: 1, 8>}, {pipeline_mode = #tpu.pipeline_mode<synchronous>, transform_indices = @transform_3, window_bounds = array<i64: 1, 8>}, {pipeline_mode = #tpu.pipeline_mode<synchronous>, transform_indices = @transform_4, window_bounds = array<i64: 8, 8>}, {pipeline_mode = #tpu.pipeline_mode<synchronous>, transform_indices = @transform_5, window_bounds = array<i64: 8, 8>}, {pipeline_mode = #tpu.pipeline_mode<synchronous>, transform_indices = @transform_6, window_bounds = array<i64: 2, 24, 16>}, {pipeline_mode = #tpu.pipeline_mode<synchronous>, transform_indices = @transform_7, window_bounds = array<i64: 1, 16>}, {pipeline_mode = #tpu.pipeline_mode<synchronous>, transform_indices = @transform_8, window_bounds = array<i64: 8, 16>}, {pipeline_mode = #tpu.pipeline_mode<synchronous>, transform_indices = @transform_9, window_bounds = array<i64: 1, 16>}, {transform_indices = @transform_10, window_bounds = array<i64: 1, 8, 8>}, {transform_indices = @transform_11, window_bounds = array<i64: 1, 3, 8, 8>}, {transform_indices = @transform_12, window_bounds = array<i64: 1, 8, 8>}]} {
    %c0 = arith.constant 0 : index
    %c0_0 = arith.constant 0 : index
    %c0_1 = arith.constant 0 : index
    %c0_2 = arith.constant 0 : index
    %0 = vector.load %arg1[%c0, %c0_0, %c0_1, %c0_2] : memref<1x4x8x8xf32, #tpu.memory_space<vmem>>, vector<1x4x8x8xf32>
    %1 = vector.shape_cast %0 : vector<1x4x8x8xf32> to vector<4x8x8xf32>
    %cst = arith.constant dense<0.000000e+00> : vector<4x8xf32>
    %2 = vector.multi_reduction <add>, %1, %cst [1] : vector<4x8x8xf32> to vector<4x8xf32>
    %3 = vector.shape_cast %2 : vector<4x8xf32> to vector<4x1x8xf32>
    %cst_3 = arith.constant 8.000000e+00 : f32
    %4 = vector.broadcast %cst_3 : f32 to vector<4x1x8xf32>
    %5 = arith.divf %3, %4 : vector<4x1x8xf32>
    %6 = vector.broadcast %5 : vector<4x1x8xf32> to vector<4x8x8xf32>
    %7 = arith.subf %1, %6 : vector<4x8x8xf32>
    %8 = arith.mulf %7, %7 : vector<4x8x8xf32>
    %cst_4 = arith.constant dense<0.000000e+00> : vector<4x8xf32>
    %9 = vector.multi_reduction <add>, %8, %cst_4 [1] : vector<4x8x8xf32> to vector<4x8xf32>
    %10 = vector.shape_cast %9 : vector<4x8xf32> to vector<4x1x8xf32>
    %cst_5 = arith.constant 7.000000e+00 : f32
    %11 = vector.broadcast %cst_5 : f32 to vector<4x1x8xf32>
    %12 = arith.divf %10, %11 : vector<4x1x8xf32>
    %13 = vector.broadcast %5 : vector<4x1x8xf32> to vector<4x8x8xf32>
    %14 = arith.subf %1, %13 : vector<4x8x8xf32>
    %cst_6 = arith.constant 9.99999974E-6 : f32
    %15 = vector.broadcast %cst_6 : f32 to vector<4x1x8xf32>
    %16 = arith.addf %12, %15 : vector<4x1x8xf32>
    %17 = math.rsqrt %16 : vector<4x1x8xf32>
    %18 = vector.broadcast %17 : vector<4x1x8xf32> to vector<4x8x8xf32>
    %19 = arith.mulf %14, %18 : vector<4x8x8xf32>
    %c0_7 = arith.constant 0 : index
    %c0_8 = arith.constant 0 : index
    %20 = vector.load %arg3[%c0_7, %c0_8] : memref<1x8xf32, #tpu.memory_space<vmem>>, vector<1x8xf32>
    %21 = vector.shape_cast %20 : vector<1x8xf32> to vector<1x1x8xf32>
    %22 = vector.broadcast %21 : vector<1x1x8xf32> to vector<4x8x8xf32>
    %23 = arith.mulf %19, %22 : vector<4x8x8xf32>
    %c0_9 = arith.constant 0 : index
    %c0_10 = arith.constant 0 : index
    %24 = vector.load %arg4[%c0_9, %c0_10] : memref<1x8xf32, #tpu.memory_space<vmem>>, vector<1x8xf32>
    %25 = vector.shape_cast %24 : vector<1x8xf32> to vector<1x1x8xf32>
    %26 = vector.broadcast %25 : vector<1x1x8xf32> to vector<4x8x8xf32>
    %27 = arith.addf %23, %26 : vector<4x8x8xf32>
    %c0_11 = arith.constant 0 : index
    %c0_12 = arith.constant 0 : index
    %c0_13 = arith.constant 0 : index
    %28 = vector.load %arg2[%c0_11, %c0_12, %c0_13] : memref<2x8x8xf32, #tpu.memory_space<vmem>>, vector<1x8x8xf32>
    %29 = vector.shape_cast %28 : vector<1x8x8xf32> to vector<8x8xf32>
    %30 = vector.shape_cast %29 : vector<8x8xf32> to vector<1x8x8xf32>
    %c1 = arith.constant 1 : index
    %c0_14 = arith.constant 0 : index
    %c0_15 = arith.constant 0 : index
    %31 = vector.load %arg2[%c1, %c0_14, %c0_15] : memref<2x8x8xf32, #tpu.memory_space<vmem>>, vector<1x8x8xf32>
    %32 = vector.shape_cast %31 : vector<1x8x8xf32> to vector<8x8xf32>
    %33 = vector.shape_cast %32 : vector<8x8xf32> to vector<1x8x8xf32>
    %34 = vector.broadcast %30 : vector<1x8x8xf32> to vector<4x8x8xf32>
    %35 = arith.subf %1, %34 : vector<4x8x8xf32>
    %cst_16 = arith.constant 9.99999974E-6 : f32
    %36 = vector.broadcast %cst_16 : f32 to vector<1x8x8xf32>
    %37 = arith.addf %33, %36 : vector<1x8x8xf32>
    %38 = math.rsqrt %37 : vector<1x8x8xf32>
    %39 = vector.broadcast %38 : vector<1x8x8xf32> to vector<4x8x8xf32>
    %40 = arith.mulf %35, %39 : vector<4x8x8xf32>
    %c0_17 = arith.constant 0 : index
    %c0_18 = arith.constant 0 : index
    %41 = vector.load %arg5[%c0_17, %c0_18] : memref<8x8xf32, #tpu.memory_space<vmem>>, vector<8x8xf32>
    %42 = vector.shape_cast %41 : vector<8x8xf32> to vector<1x8x8xf32>
    %43 = vector.broadcast %42 : vector<1x8x8xf32> to vector<4x8x8xf32>
    %44 = arith.mulf %40, %43 : vector<4x8x8xf32>
    %c0_19 = arith.constant 0 : index
    %c0_20 = arith.constant 0 : index
    %45 = vector.load %arg6[%c0_19, %c0_20] : memref<8x8xf32, #tpu.memory_space<vmem>>, vector<8x8xf32>
    %46 = vector.shape_cast %45 : vector<8x8xf32> to vector<1x8x8xf32>
    %47 = vector.broadcast %46 : vector<1x8x8xf32> to vector<4x8x8xf32>
    %48 = arith.addf %44, %47 : vector<4x8x8xf32>
    %c0_21 = arith.constant 0 : index
    %c0_22 = arith.constant 0 : index
    %c0_23 = arith.constant 0 : index
    %49 = vector.load %arg7[%c0_21, %c0_22, %c0_23] : memref<2x24x16xf32, #tpu.memory_space<vmem>>, vector<2x24x16xf32>
    %c0_24 = arith.constant 0 : index
    %c0_25 = arith.constant 0 : index
    %50 = vector.load %arg9[%c0_24, %c0_25] : memref<8x16xf32, #tpu.memory_space<vmem>>, vector<8x16xf32>
    %c0_26 = arith.constant 0 : index
    %c0_27 = arith.constant 0 : index
    %51 = vector.load %arg8[%c0_26, %c0_27] : memref<1x16xf32, #tpu.memory_space<vmem>>, vector<1x16xf32>
    %52 = vector.shape_cast %51 : vector<1x16xf32> to vector<1x16xf32>
    %53 = vector.broadcast %52 : vector<1x16xf32> to vector<8x16xf32>
    %c0_28 = arith.constant 0 : index
    %c0_29 = arith.constant 0 : index
    %54 = vector.load %arg10[%c0_28, %c0_29] : memref<1x16xf32, #tpu.memory_space<vmem>>, vector<1x16xf32>
    %55 = vector.shape_cast %54 : vector<1x16xf32> to vector<1x16xf32>
    %56 = vector.broadcast %55 : vector<1x16xf32> to vector<8x16xf32>
    %57 = vector.extract_strided_slice %1 {offsets = [0, 0, 0], sizes = [1, 8, 8], strides = [1, 1, 1]} : vector<4x8x8xf32> to vector<1x8x8xf32>
    %58 = vector.shape_cast %57 : vector<1x8x8xf32> to vector<8x8xf32>
    %59 = vector.extract_strided_slice %49 {offsets = [0, 0, 0], sizes = [1, 8, 16], strides = [1, 1, 1]} : vector<2x24x16xf32> to vector<1x8x16xf32>
    %60 = vector.shape_cast %59 : vector<1x8x16xf32> to vector<8x16xf32>
    %cst_30 = arith.constant dense<0.000000e+00> : vector<8x16xf32>
    %61 = tpu.matmul %58, %60, %cst_30 {dimension_numbers = #tpu.dot_dimension_numbers<[1], [0], [0], [1], [0, 0, 1, 1], [], []>} : vector<8x8xf32>, vector<8x16xf32>, vector<8x16xf32> -> vector<8x16xf32>
    %62 = arith.addf %53, %61 : vector<8x16xf32>
    %63 = vector.extract_strided_slice %27 {offsets = [0, 0, 0], sizes = [1, 8, 8], strides = [1, 1, 1]} : vector<4x8x8xf32> to vector<1x8x8xf32>
    %64 = vector.shape_cast %63 : vector<1x8x8xf32> to vector<8x8xf32>
    %65 = vector.extract_strided_slice %49 {offsets = [0, 8, 0], sizes = [1, 8, 16], strides = [1, 1, 1]} : vector<2x24x16xf32> to vector<1x8x16xf32>
    %66 = vector.shape_cast %65 : vector<1x8x16xf32> to vector<8x16xf32>
    %cst_31 = arith.constant dense<0.000000e+00> : vector<8x16xf32>
    %67 = tpu.matmul %64, %66, %cst_31 {dimension_numbers = #tpu.dot_dimension_numbers<[1], [0], [0], [1], [0, 0, 1, 1], [], []>} : vector<8x8xf32>, vector<8x16xf32>, vector<8x16xf32> -> vector<8x16xf32>
    %68 = arith.addf %62, %67 : vector<8x16xf32>
    %69 = vector.extract_strided_slice %48 {offsets = [0, 0, 0], sizes = [1, 8, 8], strides = [1, 1, 1]} : vector<4x8x8xf32> to vector<1x8x8xf32>
    %70 = vector.shape_cast %69 : vector<1x8x8xf32> to vector<8x8xf32>
    %71 = vector.extract_strided_slice %49 {offsets = [0, 16, 0], sizes = [1, 8, 16], strides = [1, 1, 1]} : vector<2x24x16xf32> to vector<1x8x16xf32>
    %72 = vector.shape_cast %71 : vector<1x8x16xf32> to vector<8x16xf32>
    %cst_32 = arith.constant dense<0.000000e+00> : vector<8x16xf32>
    %73 = tpu.matmul %70, %72, %cst_32 {dimension_numbers = #tpu.dot_dimension_numbers<[1], [0], [0], [1], [0, 0, 1, 1], [], []>} : vector<8x8xf32>, vector<8x16xf32>, vector<8x16xf32> -> vector<8x16xf32>
    %74 = arith.addf %68, %73 : vector<8x16xf32>
    %75 = vector.extract_strided_slice %1 {offsets = [1, 0, 0], sizes = [1, 8, 8], strides = [1, 1, 1]} : vector<4x8x8xf32> to vector<1x8x8xf32>
    %76 = vector.shape_cast %75 : vector<1x8x8xf32> to vector<8x8xf32>
    %77 = vector.extract_strided_slice %49 {offsets = [1, 0, 0], sizes = [1, 8, 16], strides = [1, 1, 1]} : vector<2x24x16xf32> to vector<1x8x16xf32>
    %78 = vector.shape_cast %77 : vector<1x8x16xf32> to vector<8x16xf32>
    %cst_33 = arith.constant dense<0.000000e+00> : vector<8x16xf32>
    %79 = tpu.matmul %76, %78, %cst_33 {dimension_numbers = #tpu.dot_dimension_numbers<[1], [0], [0], [1], [0, 0, 1, 1], [], []>} : vector<8x8xf32>, vector<8x16xf32>, vector<8x16xf32> -> vector<8x16xf32>
    %80 = arith.addf %74, %79 : vector<8x16xf32>
    %81 = vector.extract_strided_slice %27 {offsets = [1, 0, 0], sizes = [1, 8, 8], strides = [1, 1, 1]} : vector<4x8x8xf32> to vector<1x8x8xf32>
    %82 = vector.shape_cast %81 : vector<1x8x8xf32> to vector<8x8xf32>
    %83 = vector.extract_strided_slice %49 {offsets = [1, 8, 0], sizes = [1, 8, 16], strides = [1, 1, 1]} : vector<2x24x16xf32> to vector<1x8x16xf32>
    %84 = vector.shape_cast %83 : vector<1x8x16xf32> to vector<8x16xf32>
    %cst_34 = arith.constant dense<0.000000e+00> : vector<8x16xf32>
    %85 = tpu.matmul %82, %84, %cst_34 {dimension_numbers = #tpu.dot_dimension_numbers<[1], [0], [0], [1], [0, 0, 1, 1], [], []>} : vector<8x8xf32>, vector<8x16xf32>, vector<8x16xf32> -> vector<8x16xf32>
    %86 = arith.addf %80, %85 : vector<8x16xf32>
    %87 = vector.extract_strided_slice %48 {offsets = [1, 0, 0], sizes = [1, 8, 8], strides = [1, 1, 1]} : vector<4x8x8xf32> to vector<1x8x8xf32>
    %88 = vector.shape_cast %87 : vector<1x8x8xf32> to vector<8x8xf32>
    %89 = vector.extract_strided_slice %49 {offsets = [1, 16, 0], sizes = [1, 8, 16], strides = [1, 1, 1]} : vector<2x24x16xf32> to vector<1x8x16xf32>
    %90 = vector.shape_cast %89 : vector<1x8x16xf32> to vector<8x16xf32>
    %cst_35 = arith.constant dense<0.000000e+00> : vector<8x16xf32>
    %91 = tpu.matmul %88, %90, %cst_35 {dimension_numbers = #tpu.dot_dimension_numbers<[1], [0], [0], [1], [0, 0, 1, 1], [], []>} : vector<8x8xf32>, vector<8x16xf32>, vector<8x16xf32> -> vector<8x16xf32>
    %92 = arith.addf %86, %91 : vector<8x16xf32>
    %93 = vector.extract_strided_slice %92 {offsets = [0, 0], sizes = [8, 8], strides = [1, 1]} : vector<8x16xf32> to vector<8x8xf32>
    %94 = math.tanh %93 : vector<8x8xf32>
    %95 = vector.extract_strided_slice %92 {offsets = [0, 8], sizes = [8, 8], strides = [1, 1]} : vector<8x16xf32> to vector<8x8xf32>
    %96 = arith.negf %95 : vector<8x8xf32>
    %97 = math.exp %96 : vector<8x8xf32>
    %cst_36 = arith.constant 1.000000e+00 : f32
    %98 = vector.broadcast %cst_36 : f32 to vector<8x8xf32>
    %99 = arith.addf %98, %97 : vector<8x8xf32>
    %100 = arith.divf %98, %99 : vector<8x8xf32>
    %101 = arith.mulf %94, %100 : vector<8x8xf32>
    %cst_37 = arith.constant dense<0.000000e+00> : vector<8x16xf32>
    %102 = tpu.matmul %101, %50, %cst_37 {dimension_numbers = #tpu.dot_dimension_numbers<[1], [0], [0], [1], [0, 0, 1, 1], [], []>} : vector<8x8xf32>, vector<8x16xf32>, vector<8x16xf32> -> vector<8x16xf32>
    %103 = arith.addf %102, %56 : vector<8x16xf32>
    %104 = vector.extract_strided_slice %103 {offsets = [0, 0], sizes = [8, 8], strides = [1, 1]} : vector<8x16xf32> to vector<8x8xf32>
    %105 = vector.extract_strided_slice %1 {offsets = [1, 0, 0], sizes = [1, 8, 8], strides = [1, 1, 1]} : vector<4x8x8xf32> to vector<1x8x8xf32>
    %106 = vector.shape_cast %105 : vector<1x8x8xf32> to vector<8x8xf32>
    %107 = arith.addf %104, %106 : vector<8x8xf32>
    %c0_38 = arith.constant 0 : index
    %c0_39 = arith.constant 0 : index
    %c0_40 = arith.constant 0 : index
    %c0_41 = arith.constant 0 : index
    %108 = vector.load %arg12[%c0_38, %c0_39, %c0_40, %c0_41] : memref<1x3x8x8xf32, #tpu.memory_space<vmem>>, vector<1x1x8x8xf32>
    %109 = vector.shape_cast %108 : vector<1x1x8x8xf32> to vector<8x8xf32>
    %110 = vector.shape_cast %107 : vector<8x8xf32> to vector<1x1x8x8xf32>
    tpu.vector_store %arg12[%c0_38, %c0_39, %c0_40, %c0_41], %110 {strides = array<i32>} : memref<1x3x8x8xf32, #tpu.memory_space<vmem>>, vector<1x1x8x8xf32>,
    %111 = vector.extract_strided_slice %1 {offsets = [1, 0, 0], sizes = [1, 8, 8], strides = [1, 1, 1]} : vector<4x8x8xf32> to vector<1x8x8xf32>
    %112 = vector.shape_cast %111 : vector<1x8x8xf32> to vector<8x8xf32>
    %113 = vector.extract_strided_slice %49 {offsets = [0, 0, 0], sizes = [1, 8, 16], strides = [1, 1, 1]} : vector<2x24x16xf32> to vector<1x8x16xf32>
    %114 = vector.shape_cast %113 : vector<1x8x16xf32> to vector<8x16xf32>
    %cst_42 = arith.constant dense<0.000000e+00> : vector<8x16xf32>
    %115 = tpu.matmul %112, %114, %cst_42 {dimension_numbers = #tpu.dot_dimension_numbers<[1], [0], [0], [1], [0, 0, 1, 1], [], []>} : vector<8x8xf32>, vector<8x16xf32>, vector<8x16xf32> -> vector<8x16xf32>
    %116 = arith.addf %53, %115 : vector<8x16xf32>
    %117 = vector.extract_strided_slice %27 {offsets = [1, 0, 0], sizes = [1, 8, 8], strides = [1, 1, 1]} : vector<4x8x8xf32> to vector<1x8x8xf32>
    %118 = vector.shape_cast %117 : vector<1x8x8xf32> to vector<8x8xf32>
    %119 = vector.extract_strided_slice %49 {offsets = [0, 8, 0], sizes = [1, 8, 16], strides = [1, 1, 1]} : vector<2x24x16xf32> to vector<1x8x16xf32>
    %120 = vector.shape_cast %119 : vector<1x8x16xf32> to vector<8x16xf32>
    %cst_43 = arith.constant dense<0.000000e+00> : vector<8x16xf32>
    %121 = tpu.matmul %118, %120, %cst_43 {dimension_numbers = #tpu.dot_dimension_numbers<[1], [0], [0], [1], [0, 0, 1, 1], [], []>} : vector<8x8xf32>, vector<8x16xf32>, vector<8x16xf32> -> vector<8x16xf32>
    %122 = arith.addf %116, %121 : vector<8x16xf32>
    %123 = vector.extract_strided_slice %48 {offsets = [1, 0, 0], sizes = [1, 8, 8], strides = [1, 1, 1]} : vector<4x8x8xf32> to vector<1x8x8xf32>
    %124 = vector.shape_cast %123 : vector<1x8x8xf32> to vector<8x8xf32>
    %125 = vector.extract_strided_slice %49 {offsets = [0, 16, 0], sizes = [1, 8, 16], strides = [1, 1, 1]} : vector<2x24x16xf32> to vector<1x8x16xf32>
    %126 = vector.shape_cast %125 : vector<1x8x16xf32> to vector<8x16xf32>
    %cst_44 = arith.constant dense<0.000000e+00> : vector<8x16xf32>
    %127 = tpu.matmul %124, %126, %cst_44 {dimension_numbers = #tpu.dot_dimension_numbers<[1], [0], [0], [1], [0, 0, 1, 1], [], []>} : vector<8x8xf32>, vector<8x16xf32>, vector<8x16xf32> -> vector<8x16xf32>
    %128 = arith.addf %122, %127 : vector<8x16xf32>
    %129 = vector.extract_strided_slice %1 {offsets = [2, 0, 0], sizes = [1, 8, 8], strides = [1, 1, 1]} : vector<4x8x8xf32> to vector<1x8x8xf32>
    %130 = vector.shape_cast %129 : vector<1x8x8xf32> to vector<8x8xf32>
    %131 = vector.extract_strided_slice %49 {offsets = [1, 0, 0], sizes = [1, 8, 16], strides = [1, 1, 1]} : vector<2x24x16xf32> to vector<1x8x16xf32>
    %132 = vector.shape_cast %131 : vector<1x8x16xf32> to vector<8x16xf32>
    %cst_45 = arith.constant dense<0.000000e+00> : vector<8x16xf32>
    %133 = tpu.matmul %130, %132, %cst_45 {dimension_numbers = #tpu.dot_dimension_numbers<[1], [0], [0], [1], [0, 0, 1, 1], [], []>} : vector<8x8xf32>, vector<8x16xf32>, vector<8x16xf32> -> vector<8x16xf32>
    %134 = arith.addf %128, %133 : vector<8x16xf32>
    %135 = vector.extract_strided_slice %27 {offsets = [2, 0, 0], sizes = [1, 8, 8], strides = [1, 1, 1]} : vector<4x8x8xf32> to vector<1x8x8xf32>
    %136 = vector.shape_cast %135 : vector<1x8x8xf32> to vector<8x8xf32>
    %137 = vector.extract_strided_slice %49 {offsets = [1, 8, 0], sizes = [1, 8, 16], strides = [1, 1, 1]} : vector<2x24x16xf32> to vector<1x8x16xf32>
    %138 = vector.shape_cast %137 : vector<1x8x16xf32> to vector<8x16xf32>
    %cst_46 = arith.constant dense<0.000000e+00> : vector<8x16xf32>
    %139 = tpu.matmul %136, %138, %cst_46 {dimension_numbers = #tpu.dot_dimension_numbers<[1], [0], [0], [1], [0, 0, 1, 1], [], []>} : vector<8x8xf32>, vector<8x16xf32>, vector<8x16xf32> -> vector<8x16xf32>
    %140 = arith.addf %134, %139 : vector<8x16xf32>
    %141 = vector.extract_strided_slice %48 {offsets = [2, 0, 0], sizes = [1, 8, 8], strides = [1, 1, 1]} : vector<4x8x8xf32> to vector<1x8x8xf32>
    %142 = vector.shape_cast %141 : vector<1x8x8xf32> to vector<8x8xf32>
    %143 = vector.extract_strided_slice %49 {offsets = [1, 16, 0], sizes = [1, 8, 16], strides = [1, 1, 1]} : vector<2x24x16xf32> to vector<1x8x16xf32>
    %144 = vector.shape_cast %143 : vector<1x8x16xf32> to vector<8x16xf32>
    %cst_47 = arith.constant dense<0.000000e+00> : vector<8x16xf32>
    %145 = tpu.matmul %142, %144, %cst_47 {dimension_numbers = #tpu.dot_dimension_numbers<[1], [0], [0], [1], [0, 0, 1, 1], [], []>} : vector<8x8xf32>, vector<8x16xf32>, vector<8x16xf32> -> vector<8x16xf32>
    %146 = arith.addf %140, %145 : vector<8x16xf32>
    %147 = vector.extract_strided_slice %146 {offsets = [0, 0], sizes = [8, 8], strides = [1, 1]} : vector<8x16xf32> to vector<8x8xf32>
    %148 = math.tanh %147 : vector<8x8xf32>
    %149 = vector.extract_strided_slice %146 {offsets = [0, 8], sizes = [8, 8], strides = [1, 1]} : vector<8x16xf32> to vector<8x8xf32>
    %150 = arith.negf %149 : vector<8x8xf32>
    %151 = math.exp %150 : vector<8x8xf32>
    %cst_48 = arith.constant 1.000000e+00 : f32
    %152 = vector.broadcast %cst_48 : f32 to vector<8x8xf32>
    %153 = arith.addf %152, %151 : vector<8x8xf32>
    %154 = arith.divf %152, %153 : vector<8x8xf32>
    %155 = arith.mulf %148, %154 : vector<8x8xf32>
    %cst_49 = arith.constant dense<0.000000e+00> : vector<8x16xf32>
    %156 = tpu.matmul %155, %50, %cst_49 {dimension_numbers = #tpu.dot_dimension_numbers<[1], [0], [0], [1], [0, 0, 1, 1], [], []>} : vector<8x8xf32>, vector<8x16xf32>, vector<8x16xf32> -> vector<8x16xf32>
    %157 = arith.addf %156, %56 : vector<8x16xf32>
    %158 = vector.extract_strided_slice %157 {offsets = [0, 0], sizes = [8, 8], strides = [1, 1]} : vector<8x16xf32> to vector<8x8xf32>
    %159 = vector.extract_strided_slice %1 {offsets = [2, 0, 0], sizes = [1, 8, 8], strides = [1, 1, 1]} : vector<4x8x8xf32> to vector<1x8x8xf32>
    %160 = vector.shape_cast %159 : vector<1x8x8xf32> to vector<8x8xf32>
    %161 = arith.addf %158, %160 : vector<8x8xf32>
    %c0_50 = arith.constant 0 : index
    %c1_51 = arith.constant 1 : index
    %c0_52 = arith.constant 0 : index
    %c0_53 = arith.constant 0 : index
    %162 = vector.load %arg12[%c0_50, %c1_51, %c0_52, %c0_53] : memref<1x3x8x8xf32, #tpu.memory_space<vmem>>, vector<1x1x8x8xf32>
    %163 = vector.shape_cast %162 : vector<1x1x8x8xf32> to vector<8x8xf32>
    %164 = vector.shape_cast %161 : vector<8x8xf32> to vector<1x1x8x8xf32>
    tpu.vector_store %arg12[%c0_50, %c1_51, %c0_52, %c0_53], %164 {strides = array<i32>} : memref<1x3x8x8xf32, #tpu.memory_space<vmem>>, vector<1x1x8x8xf32>,
    %165 = vector.extract_strided_slice %1 {offsets = [2, 0, 0], sizes = [1, 8, 8], strides = [1, 1, 1]} : vector<4x8x8xf32> to vector<1x8x8xf32>
    %166 = vector.shape_cast %165 : vector<1x8x8xf32> to vector<8x8xf32>
    %167 = vector.extract_strided_slice %49 {offsets = [0, 0, 0], sizes = [1, 8, 16], strides = [1, 1, 1]} : vector<2x24x16xf32> to vector<1x8x16xf32>
    %168 = vector.shape_cast %167 : vector<1x8x16xf32> to vector<8x16xf32>
    %cst_54 = arith.constant dense<0.000000e+00> : vector<8x16xf32>
    %169 = tpu.matmul %166, %168, %cst_54 {dimension_numbers = #tpu.dot_dimension_numbers<[1], [0], [0], [1], [0, 0, 1, 1], [], []>} : vector<8x8xf32>, vector<8x16xf32>, vector<8x16xf32> -> vector<8x16xf32>
    %170 = arith.addf %53, %169 : vector<8x16xf32>
    %171 = vector.extract_strided_slice %27 {offsets = [2, 0, 0], sizes = [1, 8, 8], strides = [1, 1, 1]} : vector<4x8x8xf32> to vector<1x8x8xf32>
    %172 = vector.shape_cast %171 : vector<1x8x8xf32> to vector<8x8xf32>
    %173 = vector.extract_strided_slice %49 {offsets = [0, 8, 0], sizes = [1, 8, 16], strides = [1, 1, 1]} : vector<2x24x16xf32> to vector<1x8x16xf32>
    %174 = vector.shape_cast %173 : vector<1x8x16xf32> to vector<8x16xf32>
    %cst_55 = arith.constant dense<0.000000e+00> : vector<8x16xf32>
    %175 = tpu.matmul %172, %174, %cst_55 {dimension_numbers = #tpu.dot_dimension_numbers<[1], [0], [0], [1], [0, 0, 1, 1], [], []>} : vector<8x8xf32>, vector<8x16xf32>, vector<8x16xf32> -> vector<8x16xf32>
    %176 = arith.addf %170, %175 : vector<8x16xf32>
    %177 = vector.extract_strided_slice %48 {offsets = [2, 0, 0], sizes = [1, 8, 8], strides = [1, 1, 1]} : vector<4x8x8xf32> to vector<1x8x8xf32>
    %178 = vector.shape_cast %177 : vector<1x8x8xf32> to vector<8x8xf32>
    %179 = vector.extract_strided_slice %49 {offsets = [0, 16, 0], sizes = [1, 8, 16], strides = [1, 1, 1]} : vector<2x24x16xf32> to vector<1x8x16xf32>
    %180 = vector.shape_cast %179 : vector<1x8x16xf32> to vector<8x16xf32>
    %cst_56 = arith.constant dense<0.000000e+00> : vector<8x16xf32>
    %181 = tpu.matmul %178, %180, %cst_56 {dimension_numbers = #tpu.dot_dimension_numbers<[1], [0], [0], [1], [0, 0, 1, 1], [], []>} : vector<8x8xf32>, vector<8x16xf32>, vector<8x16xf32> -> vector<8x16xf32>
    %182 = arith.addf %176, %181 : vector<8x16xf32>
    %183 = vector.extract_strided_slice %1 {offsets = [3, 0, 0], sizes = [1, 8, 8], strides = [1, 1, 1]} : vector<4x8x8xf32> to vector<1x8x8xf32>
    %184 = vector.shape_cast %183 : vector<1x8x8xf32> to vector<8x8xf32>
    %185 = vector.extract_strided_slice %49 {offsets = [1, 0, 0], sizes = [1, 8, 16], strides = [1, 1, 1]} : vector<2x24x16xf32> to vector<1x8x16xf32>
    %186 = vector.shape_cast %185 : vector<1x8x16xf32> to vector<8x16xf32>
    %cst_57 = arith.constant dense<0.000000e+00> : vector<8x16xf32>
    %187 = tpu.matmul %184, %186, %cst_57 {dimension_numbers = #tpu.dot_dimension_numbers<[1], [0], [0], [1], [0, 0, 1, 1], [], []>} : vector<8x8xf32>, vector<8x16xf32>, vector<8x16xf32> -> vector<8x16xf32>
    %188 = arith.addf %182, %187 : vector<8x16xf32>
    %189 = vector.extract_strided_slice %27 {offsets = [3, 0, 0], sizes = [1, 8, 8], strides = [1, 1, 1]} : vector<4x8x8xf32> to vector<1x8x8xf32>
    %190 = vector.shape_cast %189 : vector<1x8x8xf32> to vector<8x8xf32>
    %191 = vector.extract_strided_slice %49 {offsets = [1, 8, 0], sizes = [1, 8, 16], strides = [1, 1, 1]} : vector<2x24x16xf32> to vector<1x8x16xf32>
    %192 = vector.shape_cast %191 : vector<1x8x16xf32> to vector<8x16xf32>
    %cst_58 = arith.constant dense<0.000000e+00> : vector<8x16xf32>
    %193 = tpu.matmul %190, %192, %cst_58 {dimension_numbers = #tpu.dot_dimension_numbers<[1], [0], [0], [1], [0, 0, 1, 1], [], []>} : vector<8x8xf32>, vector<8x16xf32>, vector<8x16xf32> -> vector<8x16xf32>
    %194 = arith.addf %188, %193 : vector<8x16xf32>
    %195 = vector.extract_strided_slice %48 {offsets = [3, 0, 0], sizes = [1, 8, 8], strides = [1, 1, 1]} : vector<4x8x8xf32> to vector<1x8x8xf32>
    %196 = vector.shape_cast %195 : vector<1x8x8xf32> to vector<8x8xf32>
    %197 = vector.extract_strided_slice %49 {offsets = [1, 16, 0], sizes = [1, 8, 16], strides = [1, 1, 1]} : vector<2x24x16xf32> to vector<1x8x16xf32>
    %198 = vector.shape_cast %197 : vector<1x8x16xf32> to vector<8x16xf32>
    %cst_59 = arith.constant dense<0.000000e+00> : vector<8x16xf32>
    %199 = tpu.matmul %196, %198, %cst_59 {dimension_numbers = #tpu.dot_dimension_numbers<[1], [0], [0], [1], [0, 0, 1, 1], [], []>} : vector<8x8xf32>, vector<8x16xf32>, vector<8x16xf32> -> vector<8x16xf32>
    %200 = arith.addf %194, %199 : vector<8x16xf32>
    %201 = vector.extract_strided_slice %200 {offsets = [0, 0], sizes = [8, 8], strides = [1, 1]} : vector<8x16xf32> to vector<8x8xf32>
    %202 = math.tanh %201 : vector<8x8xf32>
    %203 = vector.extract_strided_slice %200 {offsets = [0, 8], sizes = [8, 8], strides = [1, 1]} : vector<8x16xf32> to vector<8x8xf32>
    %204 = arith.negf %203 : vector<8x8xf32>
    %205 = math.exp %204 : vector<8x8xf32>
    %cst_60 = arith.constant 1.000000e+00 : f32
    %206 = vector.broadcast %cst_60 : f32 to vector<8x8xf32>
    %207 = arith.addf %206, %205 : vector<8x8xf32>
    %208 = arith.divf %206, %207 : vector<8x8xf32>
    %209 = arith.mulf %202, %208 : vector<8x8xf32>
    %cst_61 = arith.constant dense<0.000000e+00> : vector<8x16xf32>
    %210 = tpu.matmul %209, %50, %cst_61 {dimension_numbers = #tpu.dot_dimension_numbers<[1], [0], [0], [1], [0, 0, 1, 1], [], []>} : vector<8x8xf32>, vector<8x16xf32>, vector<8x16xf32> -> vector<8x16xf32>
    %211 = arith.addf %210, %56 : vector<8x16xf32>
    %212 = vector.extract_strided_slice %211 {offsets = [0, 0], sizes = [8, 8], strides = [1, 1]} : vector<8x16xf32> to vector<8x8xf32>
    %213 = vector.extract_strided_slice %1 {offsets = [3, 0, 0], sizes = [1, 8, 8], strides = [1, 1, 1]} : vector<4x8x8xf32> to vector<1x8x8xf32>
    %214 = vector.shape_cast %213 : vector<1x8x8xf32> to vector<8x8xf32>
    %215 = arith.addf %212, %214 : vector<8x8xf32>
    %c0_62 = arith.constant 0 : index
    %c2 = arith.constant 2 : index
    %c0_63 = arith.constant 0 : index
    %c0_64 = arith.constant 0 : index
    %216 = vector.load %arg12[%c0_62, %c2, %c0_63, %c0_64] : memref<1x3x8x8xf32, #tpu.memory_space<vmem>>, vector<1x1x8x8xf32>
    %217 = vector.shape_cast %216 : vector<1x1x8x8xf32> to vector<8x8xf32>
    %218 = vector.shape_cast %215 : vector<8x8xf32> to vector<1x1x8x8xf32>
    tpu.vector_store %arg12[%c0_62, %c2, %c0_63, %c0_64], %218 {strides = array<i32>} : memref<1x3x8x8xf32, #tpu.memory_space<vmem>>, vector<1x1x8x8xf32>,
    %c0_65 = arith.constant 0 : index
    %c0_66 = arith.constant 0 : index
    %c0_67 = arith.constant 0 : index
    %219 = vector.load %arg11[%c0_65, %c0_66, %c0_67] : memref<1x8x8xf32, #tpu.memory_space<vmem>>, vector<1x8x8xf32>
    %220 = vector.shape_cast %219 : vector<1x8x8xf32> to vector<8x8xf32>
    %221 = vector.extract_strided_slice %211 {offsets = [0, 8], sizes = [8, 8], strides = [1, 1]} : vector<8x16xf32> to vector<8x8xf32>
    %222 = arith.addf %220, %221 : vector<8x8xf32>
    %c0_68 = arith.constant 0 : index
    %c0_69 = arith.constant 0 : index
    %c0_70 = arith.constant 0 : index
    %223 = vector.load %arg13[%c0_68, %c0_69, %c0_70] : memref<1x8x8xf32, #tpu.memory_space<vmem>>, vector<1x8x8xf32>
    %224 = vector.shape_cast %223 : vector<1x8x8xf32> to vector<8x8xf32>
    %225 = vector.shape_cast %222 : vector<8x8xf32> to vector<1x8x8xf32>
    tpu.vector_store %arg13[%c0_68, %c0_69, %c0_70], %225 {strides = array<i32>} : memref<1x8x8xf32, #tpu.memory_space<vmem>>, vector<1x8x8xf32>,
    return
  }
  func.func @transform_0(%arg0: i32) -> (i32, i32, i32, i32) {
    %c0_i32 = arith.constant 0 : i32
    %c0_i32_0 = arith.constant 0 : i32
    %c0_i32_1 = arith.constant 0 : i32
    %c0_i32_2 = arith.constant 0 : i32
    return %arg0, %c0_i32, %c0_i32_0, %c0_i32_1 : i32, i32, i32, i32
  }
  func.func @transform_1(%arg0: i32) -> (i32, i32, i32) {
    %c0_i32 = arith.constant 0 : i32
    %c0_i32_0 = arith.constant 0 : i32
    %c0_i32_1 = arith.constant 0 : i32
    %c0_i32_2 = arith.constant 0 : i32
    return %c0_i32, %c0_i32_0, %c0_i32_1 : i32, i32, i32
  }
  func.func @transform_2(%arg0: i32) -> (i32, i32) {
    %c0_i32 = arith.constant 0 : i32
    %c0_i32_0 = arith.constant 0 : i32
    %c0_i32_1 = arith.constant 0 : i32
    return %c0_i32, %c0_i32_0 : i32, i32
  }
  func.func @transform_3(%arg0: i32) -> (i32, i32) {
    %c0_i32 = arith.constant 0 : i32
    %c0_i32_0 = arith.constant 0 : i32
    %c0_i32_1 = arith.constant 0 : i32
    return %c0_i32, %c0_i32_0 : i32, i32
  }
  func.func @transform_4(%arg0: i32) -> (i32, i32) {
    %c0_i32 = arith.constant 0 : i32
    %c0_i32_0 = arith.constant 0 : i32
    %c0_i32_1 = arith.constant 0 : i32
    return %c0_i32, %c0_i32_0 : i32, i32
  }
  func.func @transform_5(%arg0: i32) -> (i32, i32) {
    %c0_i32 = arith.constant 0 : i32
    %c0_i32_0 = arith.constant 0 : i32
    %c0_i32_1 = arith.constant 0 : i32
    return %c0_i32, %c0_i32_0 : i32, i32
  }
  func.func @transform_6(%arg0: i32) -> (i32, i32, i32) {
    %c0_i32 = arith.constant 0 : i32
    %c0_i32_0 = arith.constant 0 : i32
    %c0_i32_1 = arith.constant 0 : i32
    %c0_i32_2 = arith.constant 0 : i32
    return %c0_i32, %c0_i32_0, %c0_i32_1 : i32, i32, i32
  }
  func.func @transform_7(%arg0: i32) -> (i32, i32) {
    %c0_i32 = arith.constant 0 : i32
    %c0_i32_0 = arith.constant 0 : i32
    %c0_i32_1 = arith.constant 0 : i32
    return %c0_i32, %c0_i32_0 : i32, i32
  }
  func.func @transform_8(%arg0: i32) -> (i32, i32) {
    %c0_i32 = arith.constant 0 : i32
    %c0_i32_0 = arith.constant 0 : i32
    %c0_i32_1 = arith.constant 0 : i32
    return %c0_i32, %c0_i32_0 : i32, i32
  }
  func.func @transform_9(%arg0: i32) -> (i32, i32) {
    %c0_i32 = arith.constant 0 : i32
    %c0_i32_0 = arith.constant 0 : i32
    %c0_i32_1 = arith.constant 0 : i32
    return %c0_i32, %c0_i32_0 : i32, i32
  }
  func.func @transform_10(%arg0: i32) -> (i32, i32, i32) {
    %c0_i32 = arith.constant 0 : i32
    %c0_i32_0 = arith.constant 0 : i32
    %c0_i32_1 = arith.constant 0 : i32
    return %arg0, %c0_i32, %c0_i32_0 : i32, i32, i32
  }
  func.func @transform_11(%arg0: i32) -> (i32, i32, i32, i32) {
    %c0_i32 = arith.constant 0 : i32
    %c0_i32_0 = arith.constant 0 : i32
    %c0_i32_1 = arith.constant 0 : i32
    %c0_i32_2 = arith.constant 0 : i32
    return %arg0, %c0_i32, %c0_i32_0, %c0_i32_1 : i32, i32, i32, i32
  }
  func.func @transform_12(%arg0: i32) -> (i32, i32, i32) {
    %c0_i32 = arith.constant 0 : i32
    %c0_i32_0 = arith.constant 0 : i32
    %c0_i32_1 = arith.constant 0 : i32
    return %arg0, %c0_i32, %c0_i32_0 : i32, i32, i32
  }
}

module attributes {stable_mosaic.version = 11 : i64} {
  func.func @_tnorm_stats_kernel(%arg0: i32, %arg1: memref<2x3x8x8xf32, #tpu.memory_space<vmem>>, %arg2: memref<2x8x8xf32, #tpu.memory_space<vmem>>) attributes {dimension_semantics = [#tpu.dimension_semantics<parallel>], iteration_bounds = array<i64: 1>, scalar_prefetch = 0 : i64, scratch_operands = 0 : i64, tpu.core_type = #tpu.core_type<tc>, window_params = [{transform_indices = @transform_0, window_bounds = array<i64: 2, 3, 8, 8>}, {transform_indices = @transform_1, window_bounds = array<i64: 2, 8, 8>}]} {
    %c0 = arith.constant 0 : index
    %c0_0 = arith.constant 0 : index
    %c0_1 = arith.constant 0 : index
    %c0_2 = arith.constant 0 : index
    %0 = vector.load %arg1[%c0, %c0_0, %c0_1, %c0_2] : memref<2x3x8x8xf32, #tpu.memory_space<vmem>>, vector<2x3x8x8xf32>
    %cst = arith.constant dense<0.000000e+00> : vector<3x8x8xf32>
    %1 = vector.multi_reduction <add>, %0, %cst [0] : vector<2x3x8x8xf32> to vector<3x8x8xf32>
    %cst_3 = arith.constant 2.000000e+00 : f32
    %2 = vector.broadcast %cst_3 : f32 to vector<3x8x8xf32>
    %3 = arith.divf %1, %2 : vector<3x8x8xf32>
    %cst_4 = arith.constant dense<0.000000e+00> : vector<8x8xf32>
    %4 = vector.multi_reduction <add>, %3, %cst_4 [0] : vector<3x8x8xf32> to vector<8x8xf32>
    %cst_5 = arith.constant 3.000000e+00 : f32
    %5 = vector.broadcast %cst_5 : f32 to vector<8x8xf32>
    %6 = arith.divf %4, %5 : vector<8x8xf32>
    %7 = vector.shape_cast %6 : vector<8x8xf32> to vector<1x1x8x8xf32>
    %8 = vector.broadcast %7 : vector<1x1x8x8xf32> to vector<2x3x8x8xf32>
    %9 = arith.subf %0, %8 : vector<2x3x8x8xf32>
    %10 = arith.mulf %9, %9 : vector<2x3x8x8xf32>
    %cst_6 = arith.constant dense<0.000000e+00> : vector<3x8x8xf32>
    %11 = vector.multi_reduction <add>, %10, %cst_6 [0] : vector<2x3x8x8xf32> to vector<3x8x8xf32>
    %cst_7 = arith.constant 2.000000e+00 : f32
    %12 = vector.broadcast %cst_7 : f32 to vector<3x8x8xf32>
    %13 = arith.divf %11, %12 : vector<3x8x8xf32>
    %cst_8 = arith.constant dense<0.000000e+00> : vector<8x8xf32>
    %14 = vector.multi_reduction <add>, %13, %cst_8 [0] : vector<3x8x8xf32> to vector<8x8xf32>
    %cst_9 = arith.constant 3.000000e+00 : f32
    %15 = vector.broadcast %cst_9 : f32 to vector<8x8xf32>
    %16 = arith.divf %14, %15 : vector<8x8xf32>
    %c0_10 = arith.constant 0 : index
    %c0_11 = arith.constant 0 : index
    %c0_12 = arith.constant 0 : index
    %17 = vector.load %arg2[%c0_10, %c0_11, %c0_12] : memref<2x8x8xf32, #tpu.memory_space<vmem>>, vector<1x8x8xf32>
    %18 = vector.shape_cast %17 : vector<1x8x8xf32> to vector<8x8xf32>
    %19 = vector.shape_cast %6 : vector<8x8xf32> to vector<1x8x8xf32>
    tpu.vector_store %arg2[%c0_10, %c0_11, %c0_12], %19 {strides = array<i32>} : memref<2x8x8xf32, #tpu.memory_space<vmem>>, vector<1x8x8xf32>,
    %c1 = arith.constant 1 : index
    %c0_13 = arith.constant 0 : index
    %c0_14 = arith.constant 0 : index
    %20 = vector.load %arg2[%c1, %c0_13, %c0_14] : memref<2x8x8xf32, #tpu.memory_space<vmem>>, vector<1x8x8xf32>
    %21 = vector.shape_cast %20 : vector<1x8x8xf32> to vector<8x8xf32>
    %22 = vector.shape_cast %16 : vector<8x8xf32> to vector<1x8x8xf32>
    tpu.vector_store %arg2[%c1, %c0_13, %c0_14], %22 {strides = array<i32>} : memref<2x8x8xf32, #tpu.memory_space<vmem>>, vector<1x8x8xf32>,
    return
  }
  func.func @transform_0(%arg0: i32) -> (i32, i32, i32, i32) {
    %c0_i32 = arith.constant 0 : i32
    %c0_i32_0 = arith.constant 0 : i32
    %c0_i32_1 = arith.constant 0 : i32
    %c0_i32_2 = arith.constant 0 : i32
    return %c0_i32, %c0_i32_0, %arg0, %c0_i32_1 : i32, i32, i32, i32
  }
  func.func @transform_1(%arg0: i32) -> (i32, i32, i32) {
    %c0_i32 = arith.constant 0 : i32
    %c0_i32_0 = arith.constant 0 : i32
    %c0_i32_1 = arith.constant 0 : i32
    return %c0_i32, %arg0, %c0_i32_0 : i32, i32, i32
  }
}

module attributes {stable_mosaic.version = 11 : i64} {
  func.func @_layer_kernel(%arg0: i32, %arg1: memref<1x3x8x8xf32, #tpu.memory_space<vmem>>, %arg2: memref<2x8x8xf32, #tpu.memory_space<vmem>>, %arg3: memref<1x8xf32, #tpu.memory_space<vmem>>, %arg4: memref<1x8xf32, #tpu.memory_space<vmem>>, %arg5: memref<8x8xf32, #tpu.memory_space<vmem>>, %arg6: memref<8x8xf32, #tpu.memory_space<vmem>>, %arg7: memref<2x24x16xf32, #tpu.memory_space<vmem>>, %arg8: memref<1x16xf32, #tpu.memory_space<vmem>>, %arg9: memref<8x16xf32, #tpu.memory_space<vmem>>, %arg10: memref<1x16xf32, #tpu.memory_space<vmem>>, %arg11: memref<1x8x8xf32, #tpu.memory_space<vmem>>, %arg12: memref<1x1x8x8xf32, #tpu.memory_space<vmem>>, %arg13: memref<1x8x8xf32, #tpu.memory_space<vmem>>) attributes {dimension_semantics = [#tpu.dimension_semantics<parallel>], iteration_bounds = array<i64: 2>, scalar_prefetch = 0 : i64, scratch_operands = 0 : i64, tpu.core_type = #tpu.core_type<tc>, window_params = [{transform_indices = @transform_0, window_bounds = array<i64: 1, 3, 8, 8>}, {pipeline_mode = #tpu.pipeline_mode<synchronous>, transform_indices = @transform_1, window_bounds = array<i64: 2, 8, 8>}, {pipeline_mode = #tpu.pipeline_mode<synchronous>, transform_indices = @transform_2, window_bounds = array<i64: 1, 8>}, {pipeline_mode = #tpu.pipeline_mode<synchronous>, transform_indices = @transform_3, window_bounds = array<i64: 1, 8>}, {pipeline_mode = #tpu.pipeline_mode<synchronous>, transform_indices = @transform_4, window_bounds = array<i64: 8, 8>}, {pipeline_mode = #tpu.pipeline_mode<synchronous>, transform_indices = @transform_5, window_bounds = array<i64: 8, 8>}, {pipeline_mode = #tpu.pipeline_mode<synchronous>, transform_indices = @transform_6, window_bounds = array<i64: 2, 24, 16>}, {pipeline_mode = #tpu.pipeline_mode<synchronous>, transform_indices = @transform_7, window_bounds = array<i64: 1, 16>}, {pipeline_mode = #tpu.pipeline_mode<synchronous>, transform_indices = @transform_8, window_bounds = array<i64: 8, 16>}, {pipeline_mode = #tpu.pipeline_mode<synchronous>, transform_indices = @transform_9, window_bounds = array<i64: 1, 16>}, {transform_indices = @transform_10, window_bounds = array<i64: 1, 8, 8>}, {transform_indices = @transform_11, window_bounds = array<i64: 1, 1, 8, 8>}, {transform_indices = @transform_12, window_bounds = array<i64: 1, 8, 8>}]} {
    %c0 = arith.constant 0 : index
    %c0_0 = arith.constant 0 : index
    %c0_1 = arith.constant 0 : index
    %c0_2 = arith.constant 0 : index
    %0 = vector.load %arg1[%c0, %c0_0, %c0_1, %c0_2] : memref<1x3x8x8xf32, #tpu.memory_space<vmem>>, vector<1x3x8x8xf32>
    %1 = vector.shape_cast %0 : vector<1x3x8x8xf32> to vector<3x8x8xf32>
    %cst = arith.constant dense<0.000000e+00> : vector<3x8xf32>
    %2 = vector.multi_reduction <add>, %1, %cst [1] : vector<3x8x8xf32> to vector<3x8xf32>
    %3 = vector.shape_cast %2 : vector<3x8xf32> to vector<3x1x8xf32>
    %cst_3 = arith.constant 8.000000e+00 : f32
    %4 = vector.broadcast %cst_3 : f32 to vector<3x1x8xf32>
    %5 = arith.divf %3, %4 : vector<3x1x8xf32>
    %6 = vector.broadcast %5 : vector<3x1x8xf32> to vector<3x8x8xf32>
    %7 = arith.subf %1, %6 : vector<3x8x8xf32>
    %8 = arith.mulf %7, %7 : vector<3x8x8xf32>
    %cst_4 = arith.constant dense<0.000000e+00> : vector<3x8xf32>
    %9 = vector.multi_reduction <add>, %8, %cst_4 [1] : vector<3x8x8xf32> to vector<3x8xf32>
    %10 = vector.shape_cast %9 : vector<3x8xf32> to vector<3x1x8xf32>
    %cst_5 = arith.constant 7.000000e+00 : f32
    %11 = vector.broadcast %cst_5 : f32 to vector<3x1x8xf32>
    %12 = arith.divf %10, %11 : vector<3x1x8xf32>
    %13 = vector.broadcast %5 : vector<3x1x8xf32> to vector<3x8x8xf32>
    %14 = arith.subf %1, %13 : vector<3x8x8xf32>
    %cst_6 = arith.constant 9.99999974E-6 : f32
    %15 = vector.broadcast %cst_6 : f32 to vector<3x1x8xf32>
    %16 = arith.addf %12, %15 : vector<3x1x8xf32>
    %17 = math.rsqrt %16 : vector<3x1x8xf32>
    %18 = vector.broadcast %17 : vector<3x1x8xf32> to vector<3x8x8xf32>
    %19 = arith.mulf %14, %18 : vector<3x8x8xf32>
    %c0_7 = arith.constant 0 : index
    %c0_8 = arith.constant 0 : index
    %20 = vector.load %arg3[%c0_7, %c0_8] : memref<1x8xf32, #tpu.memory_space<vmem>>, vector<1x8xf32>
    %21 = vector.shape_cast %20 : vector<1x8xf32> to vector<1x1x8xf32>
    %22 = vector.broadcast %21 : vector<1x1x8xf32> to vector<3x8x8xf32>
    %23 = arith.mulf %19, %22 : vector<3x8x8xf32>
    %c0_9 = arith.constant 0 : index
    %c0_10 = arith.constant 0 : index
    %24 = vector.load %arg4[%c0_9, %c0_10] : memref<1x8xf32, #tpu.memory_space<vmem>>, vector<1x8xf32>
    %25 = vector.shape_cast %24 : vector<1x8xf32> to vector<1x1x8xf32>
    %26 = vector.broadcast %25 : vector<1x1x8xf32> to vector<3x8x8xf32>
    %27 = arith.addf %23, %26 : vector<3x8x8xf32>
    %c0_11 = arith.constant 0 : index
    %c0_12 = arith.constant 0 : index
    %c0_13 = arith.constant 0 : index
    %28 = vector.load %arg2[%c0_11, %c0_12, %c0_13] : memref<2x8x8xf32, #tpu.memory_space<vmem>>, vector<1x8x8xf32>
    %29 = vector.shape_cast %28 : vector<1x8x8xf32> to vector<8x8xf32>
    %30 = vector.shape_cast %29 : vector<8x8xf32> to vector<1x8x8xf32>
    %c1 = arith.constant 1 : index
    %c0_14 = arith.constant 0 : index
    %c0_15 = arith.constant 0 : index
    %31 = vector.load %arg2[%c1, %c0_14, %c0_15] : memref<2x8x8xf32, #tpu.memory_space<vmem>>, vector<1x8x8xf32>
    %32 = vector.shape_cast %31 : vector<1x8x8xf32> to vector<8x8xf32>
    %33 = vector.shape_cast %32 : vector<8x8xf32> to vector<1x8x8xf32>
    %34 = vector.broadcast %30 : vector<1x8x8xf32> to vector<3x8x8xf32>
    %35 = arith.subf %1, %34 : vector<3x8x8xf32>
    %cst_16 = arith.constant 9.99999974E-6 : f32
    %36 = vector.broadcast %cst_16 : f32 to vector<1x8x8xf32>
    %37 = arith.addf %33, %36 : vector<1x8x8xf32>
    %38 = math.rsqrt %37 : vector<1x8x8xf32>
    %39 = vector.broadcast %38 : vector<1x8x8xf32> to vector<3x8x8xf32>
    %40 = arith.mulf %35, %39 : vector<3x8x8xf32>
    %c0_17 = arith.constant 0 : index
    %c0_18 = arith.constant 0 : index
    %41 = vector.load %arg5[%c0_17, %c0_18] : memref<8x8xf32, #tpu.memory_space<vmem>>, vector<8x8xf32>
    %42 = vector.shape_cast %41 : vector<8x8xf32> to vector<1x8x8xf32>
    %43 = vector.broadcast %42 : vector<1x8x8xf32> to vector<3x8x8xf32>
    %44 = arith.mulf %40, %43 : vector<3x8x8xf32>
    %c0_19 = arith.constant 0 : index
    %c0_20 = arith.constant 0 : index
    %45 = vector.load %arg6[%c0_19, %c0_20] : memref<8x8xf32, #tpu.memory_space<vmem>>, vector<8x8xf32>
    %46 = vector.shape_cast %45 : vector<8x8xf32> to vector<1x8x8xf32>
    %47 = vector.broadcast %46 : vector<1x8x8xf32> to vector<3x8x8xf32>
    %48 = arith.addf %44, %47 : vector<3x8x8xf32>
    %c0_21 = arith.constant 0 : index
    %c0_22 = arith.constant 0 : index
    %c0_23 = arith.constant 0 : index
    %49 = vector.load %arg7[%c0_21, %c0_22, %c0_23] : memref<2x24x16xf32, #tpu.memory_space<vmem>>, vector<2x24x16xf32>
    %c0_24 = arith.constant 0 : index
    %c0_25 = arith.constant 0 : index
    %50 = vector.load %arg9[%c0_24, %c0_25] : memref<8x16xf32, #tpu.memory_space<vmem>>, vector<8x16xf32>
    %c0_26 = arith.constant 0 : index
    %c0_27 = arith.constant 0 : index
    %51 = vector.load %arg8[%c0_26, %c0_27] : memref<1x16xf32, #tpu.memory_space<vmem>>, vector<1x16xf32>
    %52 = vector.shape_cast %51 : vector<1x16xf32> to vector<1x16xf32>
    %53 = vector.broadcast %52 : vector<1x16xf32> to vector<8x16xf32>
    %c0_28 = arith.constant 0 : index
    %c0_29 = arith.constant 0 : index
    %54 = vector.load %arg10[%c0_28, %c0_29] : memref<1x16xf32, #tpu.memory_space<vmem>>, vector<1x16xf32>
    %55 = vector.shape_cast %54 : vector<1x16xf32> to vector<1x16xf32>
    %56 = vector.broadcast %55 : vector<1x16xf32> to vector<8x16xf32>
    %57 = vector.extract_strided_slice %1 {offsets = [0, 0, 0], sizes = [1, 8, 8], strides = [1, 1, 1]} : vector<3x8x8xf32> to vector<1x8x8xf32>
    %58 = vector.shape_cast %57 : vector<1x8x8xf32> to vector<8x8xf32>
    %59 = vector.extract_strided_slice %49 {offsets = [0, 0, 0], sizes = [1, 8, 16], strides = [1, 1, 1]} : vector<2x24x16xf32> to vector<1x8x16xf32>
    %60 = vector.shape_cast %59 : vector<1x8x16xf32> to vector<8x16xf32>
    %cst_30 = arith.constant dense<0.000000e+00> : vector<8x16xf32>
    %61 = tpu.matmul %58, %60, %cst_30 {dimension_numbers = #tpu.dot_dimension_numbers<[1], [0], [0], [1], [0, 0, 1, 1], [], []>} : vector<8x8xf32>, vector<8x16xf32>, vector<8x16xf32> -> vector<8x16xf32>
    %62 = arith.addf %53, %61 : vector<8x16xf32>
    %63 = vector.extract_strided_slice %27 {offsets = [0, 0, 0], sizes = [1, 8, 8], strides = [1, 1, 1]} : vector<3x8x8xf32> to vector<1x8x8xf32>
    %64 = vector.shape_cast %63 : vector<1x8x8xf32> to vector<8x8xf32>
    %65 = vector.extract_strided_slice %49 {offsets = [0, 8, 0], sizes = [1, 8, 16], strides = [1, 1, 1]} : vector<2x24x16xf32> to vector<1x8x16xf32>
    %66 = vector.shape_cast %65 : vector<1x8x16xf32> to vector<8x16xf32>
    %cst_31 = arith.constant dense<0.000000e+00> : vector<8x16xf32>
    %67 = tpu.matmul %64, %66, %cst_31 {dimension_numbers = #tpu.dot_dimension_numbers<[1], [0], [0], [1], [0, 0, 1, 1], [], []>} : vector<8x8xf32>, vector<8x16xf32>, vector<8x16xf32> -> vector<8x16xf32>
    %68 = arith.addf %62, %67 : vector<8x16xf32>
    %69 = vector.extract_strided_slice %48 {offsets = [0, 0, 0], sizes = [1, 8, 8], strides = [1, 1, 1]} : vector<3x8x8xf32> to vector<1x8x8xf32>
    %70 = vector.shape_cast %69 : vector<1x8x8xf32> to vector<8x8xf32>
    %71 = vector.extract_strided_slice %49 {offsets = [0, 16, 0], sizes = [1, 8, 16], strides = [1, 1, 1]} : vector<2x24x16xf32> to vector<1x8x16xf32>
    %72 = vector.shape_cast %71 : vector<1x8x16xf32> to vector<8x16xf32>
    %cst_32 = arith.constant dense<0.000000e+00> : vector<8x16xf32>
    %73 = tpu.matmul %70, %72, %cst_32 {dimension_numbers = #tpu.dot_dimension_numbers<[1], [0], [0], [1], [0, 0, 1, 1], [], []>} : vector<8x8xf32>, vector<8x16xf32>, vector<8x16xf32> -> vector<8x16xf32>
    %74 = arith.addf %68, %73 : vector<8x16xf32>
    %75 = vector.extract_strided_slice %1 {offsets = [2, 0, 0], sizes = [1, 8, 8], strides = [1, 1, 1]} : vector<3x8x8xf32> to vector<1x8x8xf32>
    %76 = vector.shape_cast %75 : vector<1x8x8xf32> to vector<8x8xf32>
    %77 = vector.extract_strided_slice %49 {offsets = [1, 0, 0], sizes = [1, 8, 16], strides = [1, 1, 1]} : vector<2x24x16xf32> to vector<1x8x16xf32>
    %78 = vector.shape_cast %77 : vector<1x8x16xf32> to vector<8x16xf32>
    %cst_33 = arith.constant dense<0.000000e+00> : vector<8x16xf32>
    %79 = tpu.matmul %76, %78, %cst_33 {dimension_numbers = #tpu.dot_dimension_numbers<[1], [0], [0], [1], [0, 0, 1, 1], [], []>} : vector<8x8xf32>, vector<8x16xf32>, vector<8x16xf32> -> vector<8x16xf32>
    %80 = arith.addf %74, %79 : vector<8x16xf32>
    %81 = vector.extract_strided_slice %27 {offsets = [2, 0, 0], sizes = [1, 8, 8], strides = [1, 1, 1]} : vector<3x8x8xf32> to vector<1x8x8xf32>
    %82 = vector.shape_cast %81 : vector<1x8x8xf32> to vector<8x8xf32>
    %83 = vector.extract_strided_slice %49 {offsets = [1, 8, 0], sizes = [1, 8, 16], strides = [1, 1, 1]} : vector<2x24x16xf32> to vector<1x8x16xf32>
    %84 = vector.shape_cast %83 : vector<1x8x16xf32> to vector<8x16xf32>
    %cst_34 = arith.constant dense<0.000000e+00> : vector<8x16xf32>
    %85 = tpu.matmul %82, %84, %cst_34 {dimension_numbers = #tpu.dot_dimension_numbers<[1], [0], [0], [1], [0, 0, 1, 1], [], []>} : vector<8x8xf32>, vector<8x16xf32>, vector<8x16xf32> -> vector<8x16xf32>
    %86 = arith.addf %80, %85 : vector<8x16xf32>
    %87 = vector.extract_strided_slice %48 {offsets = [2, 0, 0], sizes = [1, 8, 8], strides = [1, 1, 1]} : vector<3x8x8xf32> to vector<1x8x8xf32>
    %88 = vector.shape_cast %87 : vector<1x8x8xf32> to vector<8x8xf32>
    %89 = vector.extract_strided_slice %49 {offsets = [1, 16, 0], sizes = [1, 8, 16], strides = [1, 1, 1]} : vector<2x24x16xf32> to vector<1x8x16xf32>
    %90 = vector.shape_cast %89 : vector<1x8x16xf32> to vector<8x16xf32>
    %cst_35 = arith.constant dense<0.000000e+00> : vector<8x16xf32>
    %91 = tpu.matmul %88, %90, %cst_35 {dimension_numbers = #tpu.dot_dimension_numbers<[1], [0], [0], [1], [0, 0, 1, 1], [], []>} : vector<8x8xf32>, vector<8x16xf32>, vector<8x16xf32> -> vector<8x16xf32>
    %92 = arith.addf %86, %91 : vector<8x16xf32>
    %93 = vector.extract_strided_slice %92 {offsets = [0, 0], sizes = [8, 8], strides = [1, 1]} : vector<8x16xf32> to vector<8x8xf32>
    %94 = math.tanh %93 : vector<8x8xf32>
    %95 = vector.extract_strided_slice %92 {offsets = [0, 8], sizes = [8, 8], strides = [1, 1]} : vector<8x16xf32> to vector<8x8xf32>
    %96 = arith.negf %95 : vector<8x8xf32>
    %97 = math.exp %96 : vector<8x8xf32>
    %cst_36 = arith.constant 1.000000e+00 : f32
    %98 = vector.broadcast %cst_36 : f32 to vector<8x8xf32>
    %99 = arith.addf %98, %97 : vector<8x8xf32>
    %100 = arith.divf %98, %99 : vector<8x8xf32>
    %101 = arith.mulf %94, %100 : vector<8x8xf32>
    %cst_37 = arith.constant dense<0.000000e+00> : vector<8x16xf32>
    %102 = tpu.matmul %101, %50, %cst_37 {dimension_numbers = #tpu.dot_dimension_numbers<[1], [0], [0], [1], [0, 0, 1, 1], [], []>} : vector<8x8xf32>, vector<8x16xf32>, vector<8x16xf32> -> vector<8x16xf32>
    %103 = arith.addf %102, %56 : vector<8x16xf32>
    %104 = vector.extract_strided_slice %103 {offsets = [0, 0], sizes = [8, 8], strides = [1, 1]} : vector<8x16xf32> to vector<8x8xf32>
    %105 = vector.extract_strided_slice %1 {offsets = [2, 0, 0], sizes = [1, 8, 8], strides = [1, 1, 1]} : vector<3x8x8xf32> to vector<1x8x8xf32>
    %106 = vector.shape_cast %105 : vector<1x8x8xf32> to vector<8x8xf32>
    %107 = arith.addf %104, %106 : vector<8x8xf32>
    %c0_38 = arith.constant 0 : index
    %c0_39 = arith.constant 0 : index
    %c0_40 = arith.constant 0 : index
    %c0_41 = arith.constant 0 : index
    %108 = vector.load %arg12[%c0_38, %c0_39, %c0_40, %c0_41] : memref<1x1x8x8xf32, #tpu.memory_space<vmem>>, vector<1x1x8x8xf32>
    %109 = vector.shape_cast %108 : vector<1x1x8x8xf32> to vector<8x8xf32>
    %110 = vector.shape_cast %107 : vector<8x8xf32> to vector<1x1x8x8xf32>
    tpu.vector_store %arg12[%c0_38, %c0_39, %c0_40, %c0_41], %110 {strides = array<i32>} : memref<1x1x8x8xf32, #tpu.memory_space<vmem>>, vector<1x1x8x8xf32>,
    %c0_42 = arith.constant 0 : index
    %c0_43 = arith.constant 0 : index
    %c0_44 = arith.constant 0 : index
    %111 = vector.load %arg11[%c0_42, %c0_43, %c0_44] : memref<1x8x8xf32, #tpu.memory_space<vmem>>, vector<1x8x8xf32>
    %112 = vector.shape_cast %111 : vector<1x8x8xf32> to vector<8x8xf32>
    %113 = vector.extract_strided_slice %103 {offsets = [0, 8], sizes = [8, 8], strides = [1, 1]} : vector<8x16xf32> to vector<8x8xf32>
    %114 = arith.addf %112, %113 : vector<8x8xf32>
    %c0_45 = arith.constant 0 : index
    %c0_46 = arith.constant 0 : index
    %c0_47 = arith.constant 0 : index
    %115 = vector.load %arg13[%c0_45, %c0_46, %c0_47] : memref<1x8x8xf32, #tpu.memory_space<vmem>>, vector<1x8x8xf32>
    %116 = vector.shape_cast %115 : vector<1x8x8xf32> to vector<8x8xf32>
    %117 = vector.shape_cast %114 : vector<8x8xf32> to vector<1x8x8xf32>
    tpu.vector_store %arg13[%c0_45, %c0_46, %c0_47], %117 {strides = array<i32>} : memref<1x8x8xf32, #tpu.memory_space<vmem>>, vector<1x8x8xf32>,
    return
  }
  func.func @transform_0(%arg0: i32) -> (i32, i32, i32, i32) {
    %c0_i32 = arith.constant 0 : i32
    %c0_i32_0 = arith.constant 0 : i32
    %c0_i32_1 = arith.constant 0 : i32
    %c0_i32_2 = arith.constant 0 : i32
    return %arg0, %c0_i32, %c0_i32_0, %c0_i32_1 : i32, i32, i32, i32
  }
  func.func @transform_1(%arg0: i32) -> (i32, i32, i32) {
    %c0_i32 = arith.constant 0 : i32
    %c0_i32_0 = arith.constant 0 : i32
    %c0_i32_1 = arith.constant 0 : i32
    %c0_i32_2 = arith.constant 0 : i32
    return %c0_i32, %c0_i32_0, %c0_i32_1 : i32, i32, i32
  }
  func.func @transform_2(%arg0: i32) -> (i32, i32) {
    %c0_i32 = arith.constant 0 : i32
    %c0_i32_0 = arith.constant 0 : i32
    %c0_i32_1 = arith.constant 0 : i32
    return %c0_i32, %c0_i32_0 : i32, i32
  }
  func.func @transform_3(%arg0: i32) -> (i32, i32) {
    %c0_i32 = arith.constant 0 : i32
    %c0_i32_0 = arith.constant 0 : i32
    %c0_i32_1 = arith.constant 0 : i32
    return %c0_i32, %c0_i32_0 : i32, i32
  }
  func.func @transform_4(%arg0: i32) -> (i32, i32) {
    %c0_i32 = arith.constant 0 : i32
    %c0_i32_0 = arith.constant 0 : i32
    %c0_i32_1 = arith.constant 0 : i32
    return %c0_i32, %c0_i32_0 : i32, i32
  }
  func.func @transform_5(%arg0: i32) -> (i32, i32) {
    %c0_i32 = arith.constant 0 : i32
    %c0_i32_0 = arith.constant 0 : i32
    %c0_i32_1 = arith.constant 0 : i32
    return %c0_i32, %c0_i32_0 : i32, i32
  }
  func.func @transform_6(%arg0: i32) -> (i32, i32, i32) {
    %c0_i32 = arith.constant 0 : i32
    %c0_i32_0 = arith.constant 0 : i32
    %c0_i32_1 = arith.constant 0 : i32
    %c0_i32_2 = arith.constant 0 : i32
    return %c0_i32, %c0_i32_0, %c0_i32_1 : i32, i32, i32
  }
  func.func @transform_7(%arg0: i32) -> (i32, i32) {
    %c0_i32 = arith.constant 0 : i32
    %c0_i32_0 = arith.constant 0 : i32
    %c0_i32_1 = arith.constant 0 : i32
    return %c0_i32, %c0_i32_0 : i32, i32
  }
  func.func @transform_8(%arg0: i32) -> (i32, i32) {
    %c0_i32 = arith.constant 0 : i32
    %c0_i32_0 = arith.constant 0 : i32
    %c0_i32_1 = arith.constant 0 : i32
    return %c0_i32, %c0_i32_0 : i32, i32
  }
  func.func @transform_9(%arg0: i32) -> (i32, i32) {
    %c0_i32 = arith.constant 0 : i32
    %c0_i32_0 = arith.constant 0 : i32
    %c0_i32_1 = arith.constant 0 : i32
    return %c0_i32, %c0_i32_0 : i32, i32
  }
  func.func @transform_10(%arg0: i32) -> (i32, i32, i32) {
    %c0_i32 = arith.constant 0 : i32
    %c0_i32_0 = arith.constant 0 : i32
    %c0_i32_1 = arith.constant 0 : i32
    return %arg0, %c0_i32, %c0_i32_0 : i32, i32, i32
  }
  func.func @transform_11(%arg0: i32) -> (i32, i32, i32, i32) {
    %c0_i32 = arith.constant 0 : i32
    %c0_i32_0 = arith.constant 0 : i32
    %c0_i32_1 = arith.constant 0 : i32
    %c0_i32_2 = arith.constant 0 : i32
    return %arg0, %c0_i32, %c0_i32_0, %c0_i32_1 : i32, i32, i32, i32
  }
  func.func @transform_12(%arg0: i32) -> (i32, i32, i32) {
    %c0_i32 = arith.constant 0 : i32
    %c0_i32_0 = arith.constant 0 : i32
    %c0_i32_1 = arith.constant 0 : i32
    return %arg0, %c0_i32, %c0_i32_0 : i32, i32, i32
  }
}

module attributes {stable_mosaic.version = 11 : i64} {
  func.func @_head_kernel(%arg0: i32, %arg1: memref<1x8x8xf32, #tpu.memory_space<vmem>>, %arg2: memref<8x16xf32, #tpu.memory_space<vmem>>, %arg3: memref<1x16xf32, #tpu.memory_space<vmem>>, %arg4: memref<16x4xf32, #tpu.memory_space<vmem>>, %arg5: memref<1x4xf32, #tpu.memory_space<vmem>>, %arg6: memref<1x8x4xf32, #tpu.memory_space<vmem>>) attributes {dimension_semantics = [#tpu.dimension_semantics<parallel>], iteration_bounds = array<i64: 2>, scalar_prefetch = 0 : i64, scratch_operands = 0 : i64, tpu.core_type = #tpu.core_type<tc>, window_params = [{transform_indices = @transform_0, window_bounds = array<i64: 1, 8, 8>}, {pipeline_mode = #tpu.pipeline_mode<synchronous>, transform_indices = @transform_1, window_bounds = array<i64: 8, 16>}, {pipeline_mode = #tpu.pipeline_mode<synchronous>, transform_indices = @transform_2, window_bounds = array<i64: 1, 16>}, {pipeline_mode = #tpu.pipeline_mode<synchronous>, transform_indices = @transform_3, window_bounds = array<i64: 16, 4>}, {pipeline_mode = #tpu.pipeline_mode<synchronous>, transform_indices = @transform_4, window_bounds = array<i64: 1, 4>}, {transform_indices = @transform_5, window_bounds = array<i64: 1, 8, 4>}]} {
    %c0 = arith.constant 0 : index
    %c0_0 = arith.constant 0 : index
    %c0_1 = arith.constant 0 : index
    %0 = vector.load %arg1[%c0, %c0_0, %c0_1] : memref<1x8x8xf32, #tpu.memory_space<vmem>>, vector<1x8x8xf32>
    %1 = vector.shape_cast %0 : vector<1x8x8xf32> to vector<8x8xf32>
    %cst = arith.constant 0.000000e+00 : f32
    %2 = vector.broadcast %cst : f32 to vector<8x8xf32>
    %3 = arith.maximumf %1, %2 : vector<8x8xf32>
    %c0_2 = arith.constant 0 : index
    %c0_3 = arith.constant 0 : index
    %4 = vector.load %arg2[%c0_2, %c0_3] : memref<8x16xf32, #tpu.memory_space<vmem>>, vector<8x16xf32>
    %cst_4 = arith.constant dense<0.000000e+00> : vector<8x16xf32>
    %5 = tpu.matmul %3, %4, %cst_4 {dimension_numbers = #tpu.dot_dimension_numbers<[1], [0], [0], [1], [0, 0, 1, 1], [], []>} : vector<8x8xf32>, vector<8x16xf32>, vector<8x16xf32> -> vector<8x16xf32>
    %c0_5 = arith.constant 0 : index
    %c0_6 = arith.constant 0 : index
    %6 = vector.load %arg3[%c0_5, %c0_6] : memref<1x16xf32, #tpu.memory_space<vmem>>, vector<1x16xf32>
    %7 = vector.broadcast %6 : vector<1x16xf32> to vector<8x16xf32>
    %8 = arith.addf %5, %7 : vector<8x16xf32>
    %cst_7 = arith.constant 0.000000e+00 : f32
    %9 = vector.broadcast %cst_7 : f32 to vector<8x16xf32>
    %10 = arith.maximumf %8, %9 : vector<8x16xf32>
    %c0_8 = arith.constant 0 : index
    %c0_9 = arith.constant 0 : index
    %11 = vector.load %arg4[%c0_8, %c0_9] : memref<16x4xf32, #tpu.memory_space<vmem>>, vector<16x4xf32>
    %cst_10 = arith.constant dense<0.000000e+00> : vector<8x4xf32>
    %12 = tpu.matmul %10, %11, %cst_10 {dimension_numbers = #tpu.dot_dimension_numbers<[1], [0], [0], [1], [0, 0, 1, 1], [], []>} : vector<8x16xf32>, vector<16x4xf32>, vector<8x4xf32> -> vector<8x4xf32>
    %c0_11 = arith.constant 0 : index
    %c0_12 = arith.constant 0 : index
    %13 = vector.load %arg5[%c0_11, %c0_12] : memref<1x4xf32, #tpu.memory_space<vmem>>, vector<1x4xf32>
    %14 = vector.broadcast %13 : vector<1x4xf32> to vector<8x4xf32>
    %15 = arith.addf %12, %14 : vector<8x4xf32>
    %c0_13 = arith.constant 0 : index
    %c0_14 = arith.constant 0 : index
    %c0_15 = arith.constant 0 : index
    %16 = vector.load %arg6[%c0_13, %c0_14, %c0_15] : memref<1x8x4xf32, #tpu.memory_space<vmem>>, vector<1x8x4xf32>
    %17 = vector.shape_cast %16 : vector<1x8x4xf32> to vector<8x4xf32>
    %18 = vector.shape_cast %15 : vector<8x4xf32> to vector<1x8x4xf32>
    tpu.vector_store %arg6[%c0_13, %c0_14, %c0_15], %18 {strides = array<i32>} : memref<1x8x4xf32, #tpu.memory_space<vmem>>, vector<1x8x4xf32>,
    return
  }
  func.func @transform_0(%arg0: i32) -> (i32, i32, i32) {
    %c0_i32 = arith.constant 0 : i32
    %c0_i32_0 = arith.constant 0 : i32
    %c0_i32_1 = arith.constant 0 : i32
    return %arg0, %c0_i32, %c0_i32_0 : i32, i32, i32
  }
  func.func @transform_1(%arg0: i32) -> (i32, i32) {
    %c0_i32 = arith.constant 0 : i32
    %c0_i32_0 = arith.constant 0 : i32
    %c0_i32_1 = arith.constant 0 : i32
    return %c0_i32, %c0_i32_0 : i32, i32
  }
  func.func @transform_2(%arg0: i32) -> (i32, i32) {
    %c0_i32 = arith.constant 0 : i32
    %c0_i32_0 = arith.constant 0 : i32
    %c0_i32_1 = arith.constant 0 : i32
    return %c0_i32, %c0_i32_0 : i32, i32
  }
  func.func @transform_3(%arg0: i32) -> (i32, i32) {
    %c0_i32 = arith.constant 0 : i32
    %c0_i32_0 = arith.constant 0 : i32
    %c0_i32_1 = arith.constant 0 : i32
    return %c0_i32, %c0_i32_0 : i32, i32
  }
  func.func @transform_4(%arg0: i32) -> (i32, i32) {
    %c0_i32 = arith.constant 0 : i32
    %c0_i32_0 = arith.constant 0 : i32
    %c0_i32_1 = arith.constant 0 : i32
    return %c0_i32, %c0_i32_0 : i32, i32
  }
  func.func @transform_5(%arg0: i32) -> (i32, i32, i32) {
    %c0_i32 = arith.constant 0 : i32
    %c0_i32_0 = arith.constant 0 : i32
    %c0_i32_1 = arith.constant 0 : i32
    return %arg0, %c0_i32, %c0_i32_0 : i32, i32, i32
  }
}

</mosaic_0001>

<bundles_post_ra>
// kernel: stnorm_forward.7
= control target key start
LH: loop header
LB: loop body
LE: loop exit
PB: predicated region body
PF: predicated region fallthrough
CT: control target
= control target key end

     0   :  { %vm16_vm0 = vcmask 64512   ;;  %s157_s0 = inlined_call_operand.vmem [shape: f32[2,4,8,8], index: 0, kind: input, shape index: {}]   ;;  %s158_s1 = inlined_call_operand.vmem [shape: f32[2,8,8], index: 1, kind: output, shape index: {}]  }
   0x1   :  { %v8_v0 = vld [vmem:[%s157_s0] sm:$0xff]  ;;  %v9_v1 = vld [vmem:[%s157_s0 + $0x8] sm:$0xff]  ;;  %v10_v2 = vld [vmem:[%s157_s0 + $0x10] sm:$0xff] }
   0x2   :  { %v11_v3 = vld [vmem:[%s157_s0 + $0x18] sm:$0xff]  ;;  %v12_v4 = vld [vmem:[%s157_s0 + $0x20] sm:$0xff]  ;;  %v13_v5 = vld [vmem:[%s157_s0 + $0x28] sm:$0xff]  ;;  %v17_v6 = vsel %vm16_vm0, %v8_v0, 0.0  ;;  %v20_v7 = vsel %vm16_vm0, %v9_v1, 0.0  ;;  %v23_v8 = vsel %vm16_vm0, %v10_v2, 0.0 }
   0x3   :  { %v14_v9 = vld [vmem:[%s157_s0 + $0x30] sm:$0xff]  ;;  %v15_v10 = vld [vmem:[%s157_s0 + $0x38] sm:$0xff]  ;;  %v18_v11 = vsel %vm16_vm0, %v12_v4, 0.0  ;;  %v21_v12 = vsel %vm16_vm0, %v13_v5, 0.0  ;;  %v26_v13 = vsel %vm16_vm0, %v11_v3, 0.0 }
   0x4   :  { %v19_v14 = vadd.f32 %v18_v11, %v17_v6  ;;  %v22_v15 = vadd.f32 %v21_v12, %v20_v7  ;;  %v24_v16 = vsel %vm16_vm0, %v14_v9, 0.0  ;;  %v27_v17 = vsel %vm16_vm0, %v15_v10, 0.0 }
   0x5   :  { %v25_v18 = vadd.f32 %v24_v16, %v23_v8  ;;  %v28_v19 = vadd.f32 %v27_v17, %v26_v13 }
   0x6   :  { %v30_v20 = vmul.f32 0.5, %v19_v14  ;;  %v31_v21 = vmul.f32 0.5, %v22_v15 }
   0x7   :  { %v32_v22 = vmul.f32 0.5, %v25_v18  ;;  %v33_v23 = vmul.f32 0.5, %v28_v19 }
   0x8   :  { %v34_v24 = vsel %vm16_vm0, %v30_v20, 0.0  ;;  %v35_v25 = vsel %vm16_vm0, %v31_v21, 0.0 }
   0x9   :  { %v36_v26 = vadd.f32 %v35_v25, %v34_v24  ;;  %v37_v27 = vsel %vm16_vm0, %v32_v22, 0.0  ;;  %v39_v28 = vsel %vm16_vm0, %v33_v23, 0.0 }
   0xb   :  { %v38_v29 = vadd.f32 %v37_v27, %v36_v26 }
   0xd   :  { %v40_v30 = vadd.f32 %v39_v28, %v38_v29 }
   0xf   :  { %v42_v31 = vmul.f32 0.25, %v40_v30 }
  0x11   :  { %83 = vst.msk [vmem:[%s158_s1] sm:$0xff] %vm16_vm0, %v42_v31  ;;  %v43_v32 = vsub.f32 %v8_v0, %v42_v31  ;;  %v44_v33 = vsub.f32 %v9_v1, %v42_v31  ;;  %v45_v34 = vsub.f32 %v10_v2, %v42_v31  ;;  %v46_v35 = vsub.f32 %v11_v3, %v42_v31 }
  0x12   :  { %v47_v36 = vsub.f32 %v12_v4, %v42_v31  ;;  %v48_v37 = vsub.f32 %v13_v5, %v42_v31  ;;  %v49_v38 = vsub.f32 %v14_v9, %v42_v31  ;;  %v50_v39 = vsub.f32 %v15_v10, %v42_v31 }
  0x13   :  { %v51_v40 = vmul.f32 %v43_v32, %v43_v32  ;;  %v52_v41 = vmul.f32 %v44_v33, %v44_v33  ;;  %v53_v42 = vmul.f32 %v45_v34, %v45_v34  ;;  %v54_v43 = vmul.f32 %v46_v35, %v46_v35 }
  0x14   :  { %v55_v44 = vmul.f32 %v47_v36, %v47_v36  ;;  %v56_v45 = vmul.f32 %v48_v37, %v48_v37  ;;  %v57_v46 = vmul.f32 %v49_v38, %v49_v38  ;;  %v58_v47 = vmul.f32 %v50_v39, %v50_v39 }
  0x15   :  { %v59_v48 = vsel %vm16_vm0, %v51_v40, 0.0  ;;  %v62_v49 = vsel %vm16_vm0, %v52_v41, 0.0  ;;  %v65_v50 = vsel %vm16_vm0, %v53_v42, 0.0  ;;  %v68_v51 = vsel %vm16_vm0, %v54_v43, 0.0 }
  0x16   :  { %v60_v52 = vsel %vm16_vm0, %v55_v44, 0.0  ;;  %v63_v53 = vsel %vm16_vm0, %v56_v45, 0.0  ;;  %v66_v54 = vsel %vm16_vm0, %v57_v46, 0.0  ;;  %v69_v55 = vsel %vm16_vm0, %v58_v47, 0.0 }
  0x17   :  { %v61_v56 = vadd.f32 %v60_v52, %v59_v48  ;;  %v64_v57 = vadd.f32 %v63_v53, %v62_v49  ;;  %v67_v58 = vadd.f32 %v66_v54, %v65_v50  ;;  %v70_v59 = vadd.f32 %v69_v55, %v68_v51 }
  0x19   :  { %v71_v60 = vmul.f32 0.5, %v61_v56  ;;  %v72_v61 = vmul.f32 0.5, %v64_v57  ;;  %v73_v62 = vmul.f32 0.5, %v67_v58  ;;  %v74_v63 = vmul.f32 0.5, %v70_v59 }
  0x1b   :  { %v75_v0 = vsel %vm16_vm0, %v71_v60, 0.0  ;;  %v76_v1 = vsel %vm16_vm0, %v72_v61, 0.0  ;;  %v78_v2 = vsel %vm16_vm0, %v73_v62, 0.0  ;;  %v80_v4 = vsel %vm16_vm0, %v74_v63, 0.0 }
  0x1c   :  { %v77_v3 = vadd.f32 %v76_v1, %v75_v0 }
  0x1e   :  { %v79_v5 = vadd.f32 %v78_v2, %v77_v3 }
  0x20   :  { %v81_v6 = vadd.f32 %v80_v4, %v79_v5 }
  0x22   :  { %v82_v7 = vmul.f32 0.25, %v81_v6 }
  0x24   :  { %90 = vst.msk [vmem:[%s158_s1 + $0x8] sm:$0xff] %vm16_vm0, %v82_v7 }

// kernel: stnorm_forward.6
= control target key start
LH: loop header
LB: loop body
LE: loop exit
PB: predicated region body
PF: predicated region fallthrough
CT: control target
= control target key end

     0   :  { %s642_s12 = smov 0   ;;  %s673_s0 = inlined_call_operand.vmem [shape: f32[2,4,8,3], index: 0, kind: input, shape index: {}]   ;;  %s674_s1 = inlined_call_operand.vmem [shape: f32[3,8], index: 1, kind: input, shape index: {}]   ;;  %s675_s2 = inlined_call_operand.vmem [shape: f32[1,8], index: 2, kind: input, shape index: {}]   ;;  %s676_s3 = inlined_call_operand.vmem [shape: f32[2,4,8,8], index: 3, kind: output, shape index: {}]  }
   0x1 LB: > { %s546_s13 = sadd.s32 4294967295, %s618_s12   ;;  %p550_p0 = scmp.ge.s32.totalorder %s618_s12, 1  ;;  %s618_s12 = sphi %s642_s12, %s13_s12  }
   0x2   : > { %p137_p1 = scmp.lt.s32.totalorder %s618_s12, 3 }
   0x4   : > { %p138_p2 = pnand %p550_p0, %p137_p1 }
   0x5   : > { %v171_v0 = vld [vmem:[%s674_s1] sm:$0x7] (!%p138_p2)  ;;  %vm184_vm0 = vcmask (!%p138_p2), 1042432   ;;  %p161_p3 = scmp.lt.s32.totalorder (!%p138_p2), %s546_s13, 1  ;;  %v620_v1 = vmov (!%p138_p2), 0.0   ;;  %vm621_vm1 = vmmov (!%p138_p2), 0  }
   0x6   : > { %141 = sbr.rel (%p138_p2) target bundleno = 236 (0xec), region = 32  ;;  %582 = vmatprep.subr.mxu0 (!%p138_p2), %v620_v1  ;;  %587 = vmatprep.subr.mxu1 (!%p138_p2), %v620_v1  ;;  %vm180_vm2 = vcmask (!%p138_p2), 23552   ;;  %v555_v6 = vld [vmem:[%s675_s2] ss:$0 sm:$0xff] (!%p138_p2)  ;;  %vm258_vm3 = vcmask (!%p138_p2), 64512  }
   0x7   : > { %583 = vmatpush3.msk.msra.mxu0 (!%p138_p2), %vm184_vm0, %v171_v0  ;;  %588 = vmatpush3.msk.msra.mxu1 (!%p138_p2), %vm184_vm0, %v171_v0 }
   0x8   : > { %584 = vmatprep.mubr.msk.f32.mxu0 (!%p138_p2), %vm621_vm1, %v620_v1  ;;  %589 = vmatprep.mubr.msk.f32.mxu1 (!%p138_p2), %vm621_vm1, %v620_v1 }
   0x9   : > { %592 = vmatprep.subr.mxu0 (!%p138_p2), %v620_v1  ;;  %597 = vmatprep.subr.mxu1 (!%p138_p2), %v620_v1 }
   0xd   : > { %s678_s13 = smov (!%p161_p3, %s546_s13), 1 }
   0xe   : > { %s572_s16 = sshll.u32 %s678_s13, 5 }
   0xf   : > { %s165_s19 = scalar_lea.vmem %s673_s0, %s572_s16  ;;  %s170_s24 = scalar_lea.vmem %s676_s3, %s572_s16 }
  0x10   : > { %v173_v2 = vld [vmem:[%s165_s19] sm:$0xff]  ;;  %v558_v3 = vld [vmem:[%s165_s19 + $0x8] sm:$0xff]  ;;  %v562_v4 = vld [vmem:[%s165_s19 + $0x10] sm:$0xff] }
  0x11   : > { %585 = vmatmul.mubr.msk.f32.vlgmr.msra.gmra.mrb[0].mxu0 %vm180_vm2, %v173_v2  ;;  %590 = vmatmul.mubr.msk.f32.vlgmr.msra.gmra.mrb[0].mxu1 %vm180_vm2, %v558_v3  ;;  %v566_v5 = vld [vmem:[%s165_s19 + $0x18] sm:$0xff] }
  0x12   : > { %593 = vmatpush3.msk.msra.mxu0 %vm184_vm0, %v171_v0  ;;  %598 = vmatpush3.msk.msra.mxu1 %vm184_vm0, %v171_v0 }
  0x13   : > { %594 = vmatprep.mubr.msk.f32.mxu0 %vm621_vm1, %v620_v1  ;;  %599 = vmatprep.mubr.msk.f32.mxu1 %vm621_vm1, %v620_v1 }
  0x15   : > { %595 = vmatmul.mubr.msk.f32.vlgmr.msra.gmra.mrb[2].mxu0 %vm180_vm2, %v562_v4  ;;  %600 = vmatmul.mubr.msk.f32.vlgmr.msra.gmra.mrb[2].mxu1 %vm180_vm2, %v566_v5 }
  0xe4   : > { %v254_v7 = vpop.f32.mrb[0].mxu0  ;;  %v331_v8 = vpop.f32.mrb[0].mxu1 }
  0xe5   : > { %v255_v9 = vadd.f32 %v555_v6, %v254_v7  ;;  %v332_v10 = vadd.f32 %v555_v6, %v331_v8  ;;  %v586_v11 = vpop.f32.mrb[1].mxu0  ;;  %v591_v12 = vpop.f32.mrb[1].mxu1 }
  0xe7   : > { %259 = vst.msk [vmem:[%s170_s24] sm:$0xff] %vm258_vm3, %v255_v9  ;;  %561 = vst.msk [vmem:[%s170_s24 + $0x8] sm:$0xff] %vm258_vm3, %v332_v10 }
  0xe8   : > { %v408_v13 = vpop.f32.mrb[2].mxu0  ;;  %v485_v14 = vpop.f32.mrb[2].mxu1 }
  0xe9   : > { %v409_v15 = vadd.f32 %v555_v6, %v408_v13  ;;  %v486_v16 = vadd.f32 %v555_v6, %v485_v14  ;;  %v596_v17 = vpop.f32.mrb[3].mxu0  ;;  %v601_v18 = vpop.f32.mrb[3].mxu1 }
  0xeb   : > { %565 = vst.msk [vmem:[%s170_s24 + $0x10] sm:$0xff] %vm258_vm3, %v409_v15  ;;  %569 = vst.msk [vmem:[%s170_s24 + $0x18] sm:$0xff] %vm258_vm3, %v486_v16 }
  0xec PF: > { %s13_s12 = sadd.s32 1, %s618_s12  }
  0xed   : > { %p10_p4 = scmp.ge.s32.totalorder %s13_s12, 4  }
  0xef   :  { %12 = sbr.rel (!%p10_p4) target bundleno = 1 (0x1), region = 68 }

// kernel: stnorm_forward.9
= control target key start
LH: loop header
LB: loop body
LE: loop exit
PB: predicated region body
PF: predicated region fallthrough
CT: control target
= control target key end

     0   :  { %vm14_vm0 = vcmask 64512   ;;  %s127_s0 = inlined_call_operand.vmem [shape: f32[2,3,8,8], index: 0, kind: input, shape index: {}]   ;;  %s128_s1 = inlined_call_operand.vmem [shape: f32[2,8,8], index: 1, kind: output, shape index: {}]  }
   0x1   :  { %v8_v0 = vld [vmem:[%s127_s0] sm:$0xff]  ;;  %v9_v1 = vld [vmem:[%s127_s0 + $0x8] sm:$0xff]  ;;  %v10_v2 = vld [vmem:[%s127_s0 + $0x10] sm:$0xff] }
   0x2   :  { %v11_v3 = vld [vmem:[%s127_s0 + $0x18] sm:$0xff]  ;;  %v12_v4 = vld [vmem:[%s127_s0 + $0x20] sm:$0xff]  ;;  %v13_v5 = vld [vmem:[%s127_s0 + $0x28] sm:$0xff]  ;;  %v15_v6 = vsel %vm14_vm0, %v8_v0, 0.0  ;;  %v18_v7 = vsel %vm14_vm0, %v9_v1, 0.0  ;;  %v21_v8 = vsel %vm14_vm0, %v10_v2, 0.0 }
   0x3   :  { %v16_v9 = vsel %vm14_vm0, %v11_v3, 0.0  ;;  %v19_v10 = vsel %vm14_vm0, %v12_v4, 0.0  ;;  %v22_v11 = vsel %vm14_vm0, %v13_v5, 0.0 }
   0x4   :  { %v17_v12 = vadd.f32 %v16_v9, %v15_v6  ;;  %v20_v13 = vadd.f32 %v19_v10, %v18_v7  ;;  %v23_v14 = vadd.f32 %v22_v11, %v21_v8 }
   0x6   :  { %v25_v15 = vmul.f32 0.5, %v17_v12  ;;  %v26_v16 = vmul.f32 0.5, %v20_v13  ;;  %v27_v17 = vmul.f32 0.5, %v23_v14 }
   0x8   :  { %v28_v18 = vsel %vm14_vm0, %v25_v15, 0.0  ;;  %v29_v19 = vsel %vm14_vm0, %v26_v16, 0.0  ;;  %v31_v20 = vsel %vm14_vm0, %v27_v17, 0.0 }
   0x9   :  { %v30_v21 = vadd.f32 %v29_v19, %v28_v18 }
   0xb   :  { %v32_v22 = vadd.f32 %v31_v20, %v30_v21 }
   0xd   :  { %v34_v23 = vmul.f32 0.33333334, %v32_v22 }
   0xf   :  { %65 = vst.msk [vmem:[%s128_s1] sm:$0xff] %vm14_vm0, %v34_v23  ;;  %v35_v24 = vsub.f32 %v8_v0, %v34_v23  ;;  %v36_v25 = vsub.f32 %v9_v1, %v34_v23  ;;  %v37_v26 = vsub.f32 %v10_v2, %v34_v23  ;;  %v38_v27 = vsub.f32 %v11_v3, %v34_v23 }
  0x10   :  { %v39_v28 = vsub.f32 %v12_v4, %v34_v23  ;;  %v40_v29 = vsub.f32 %v13_v5, %v34_v23 }
  0x11   :  { %v41_v30 = vmul.f32 %v35_v24, %v35_v24  ;;  %v42_v31 = vmul.f32 %v36_v25, %v36_v25  ;;  %v43_v32 = vmul.f32 %v37_v26, %v37_v26  ;;  %v44_v33 = vmul.f32 %v38_v27, %v38_v27 }
  0x12   :  { %v45_v34 = vmul.f32 %v39_v28, %v39_v28  ;;  %v46_v35 = vmul.f32 %v40_v29, %v40_v29 }
  0x13   :  { %v47_v36 = vsel %vm14_vm0, %v41_v30, 0.0  ;;  %v48_v37 = vsel %vm14_vm0, %v44_v33, 0.0  ;;  %v50_v38 = vsel %vm14_vm0, %v42_v31, 0.0  ;;  %v53_v39 = vsel %vm14_vm0, %v43_v32, 0.0 }
  0x14   :  { %v49_v40 = vadd.f32 %v48_v37, %v47_v36  ;;  %v51_v41 = vsel %vm14_vm0, %v45_v34, 0.0  ;;  %v54_v42 = vsel %vm14_vm0, %v46_v35, 0.0 }
  0x15   :  { %v52_v43 = vadd.f32 %v51_v41, %v50_v38  ;;  %v55_v44 = vadd.f32 %v54_v42, %v53_v39 }
  0x16   :  { %v56_v45 = vmul.f32 0.5, %v49_v40 }
  0x17   :  { %v57_v46 = vmul.f32 0.5, %v52_v43  ;;  %v58_v47 = vmul.f32 0.5, %v55_v44 }
  0x18   :  { %v59_v48 = vsel %vm14_vm0, %v56_v45, 0.0 }
  0x19   :  { %v60_v49 = vsel %vm14_vm0, %v57_v46, 0.0  ;;  %v62_v50 = vsel %vm14_vm0, %v58_v47, 0.0 }
  0x1a   :  { %v61_v51 = vadd.f32 %v60_v49, %v59_v48 }
  0x1c   :  { %v63_v52 = vadd.f32 %v62_v50, %v61_v51 }
  0x1e   :  { %v64_v53 = vmul.f32 0.33333334, %v63_v52 }
  0x20   :  { %72 = vst.msk [vmem:[%s128_s1 + $0x8] sm:$0xff] %vm14_vm0, %v64_v53 }

// kernel: stnorm_forward.8
= control target key start
LH: loop header
LB: loop body
LE: loop exit
PB: predicated region body
PF: predicated region fallthrough
CT: control target
= control target key end

     0   :  { %s2620_s21 = smov 0   ;;  %s2912_s0 = inlined_call_operand.vmem [shape: f32[2,4,8,8], index: 0, kind: input, shape index: {}]   ;;  %s2913_s1 = inlined_call_operand.vmem [shape: f32[2,8,8], index: 1, kind: input, shape index: {}]   ;;  %s2914_s2 = inlined_call_operand.vmem [shape: f32[1,8], index: 2, kind: input, shape index: {}]   ;;  %s2915_s3 = inlined_call_operand.vmem [shape: f32[1,8], index: 3, kind: input, shape index: {}]   ;;  %s2916_s4 = inlined_call_operand.vmem [shape: f32[8,8], index: 4, kind: input, shape index: {}]   ;;  %s2917_s5 = inlined_call_operand.vmem [shape: f32[8,8], index: 5, kind: input, shape index: {}]   ;;  %s2918_s6 = inlined_call_operand.vmem [shape: f32[2,24,16], index: 6, kind: input, shape index: {}]   ;;  %s2919_s7 = inlined_call_operand.vmem [shape: f32[1,16], index: 7, kind: input, shape index: {}]   ;;  %s2920_s8 = inlined_call_operand.vmem [shape: f32[8,16], index: 8, kind: input, shape index: {}]   ;;  %s2921_s9 = inlined_call_operand.vmem [shape: f32[1,16], index: 9, kind: input, shape index: {}]   ;;  %s2922_s10 = inlined_call_operand.vmem [shape: f32[2,8,8], index: 10, kind: input, shape index: {}, may-alias: {10,12}]   ;;  %s2923_s11 = inlined_call_operand.vmem [shape: f32[2,3,8,8], index: 11, kind: output, shape index: {0}]   ;;  %s2924_s12 = inlined_call_operand.vmem [shape: f32[2,8,8], index: 12, kind: output, shape index: {1}, may-alias: {10,12}]  }
   0x1 LB: > { %s2281_s22 = sadd.s32 4294967295, %s2550_s21   ;;  %p2285_p0 = scmp.ge.s32.totalorder %s2550_s21, 1  ;;  %s2550_s21 = sphi %s2620_s21, %s23_s21  }
   0x2   : > { %p374_p1 = scmp.lt.s32.totalorder %s2550_s21, 3 }
   0x4   : > { %p375_p2 = pnand %p2285_p0, %p374_p1 }
   0x5   : > { %v2631_v0 = vld [vmem:[%s2918_s6 + $0x10] sm:$0xff] (!%p375_p2)  ;;  %p424_p3 = scmp.lt.s32.totalorder (!%p375_p2), %s2281_s22, 1  ;;  %v2552_v1 = vmov (!%p375_p2), 0.0   ;;  %vm2553_vm0 = vmmov (!%p375_p2), 0   ;;  %v2293_v2 = vld [vmem:[%s2913_s1 + $0x8] sm:$0xff] (!%p375_p2)  ;;  %v2646_v4 = vld [vmem:[%s2918_s6] sm:$0xff] (!%p375_p2) }
   0x6   : > { %378 = sbr.rel (%p375_p2) target bundleno = 1570 (0x622), region = 64  ;;  %2377 = vmatprep.subr.mxu0 (!%p375_p2), %v2552_v1  ;;  %2379 = vmatprep.mubr.msk.f32.mxu0 (!%p375_p2), %vm2553_vm0, %v2552_v1  ;;  %v562_v3 = vadd.f32 (!%p375_p2), 1e-05, %v2293_v2  ;;  %vm446_vm1 = vcmask (!%p375_p2), 64512   ;;  %v2662_v5 = vld [vmem:[%s2918_s6 + $0x8] sm:$0xff] (!%p375_p2)  ;;  %v2675_v11 = vld [vmem:[%s2913_s1] sm:$0xff] (!%p375_p2) }
   0x7   : > { %2378 = vmatpush3.msra.mxu0 (!%p375_p2), %v2631_v0  ;;  %2367 = vmatprep.subr.mxu1 (!%p375_p2), %v2552_v1  ;;  %v2687_v19 = vld [vmem:[%s2916_s4] sm:$0xff] (!%p375_p2)  ;;  %v2700_v30 = vld [vmem:[%s2918_s6 + $0x18] sm:$0xff] (!%p375_p2)  ;;  %s2554_s24 = smov (!%p375_p2), 120  }
   0x8   : > { %2382 = vmatprep.subr.mxu0 (!%p375_p2), %v2552_v1  ;;  %2368 = vmatpush3.msra.mxu1 (!%p375_p2), %v2646_v4  ;;  %2516 = vrsqrt.f32 (!%p375_p2), %v562_v3  ;;  %v2693_v23 = vld [vmem:[%s2917_s5] sm:$0xff] (!%p375_p2) }
   0x9   : > { %2369 = vmatprep.mubr.msk.f32.mxu1 (!%p375_p2), %vm2553_vm0, %v2552_v1  ;;  %2372 = vmatprep.subr.mxu1 (!%p375_p2), %v2552_v1  ;;  %v2713_v40 = vld [vmem:[%s2918_s6 + $0x20] sm:$0xff] (!%p375_p2) }
   0xa   : > { %v2726_v58 = vld [vmem:[%s2914_s2] ss:$0 sm:$0xff] (!%p375_p2) }
   0xb   : > { %v2731_v61 = vld [vmem:[%s2915_s3] ss:$0 sm:$0xff] (!%p375_p2) }
   0xd   : > { %s2926_s22 = smov (!%p424_p3, %s2281_s22), 1 }
   0xe   : > { %s2324_s29 = sshll.u32 %s2926_s22, 5  ;;  %s2504_s25 = smul.u32 24, %s2926_s22 }
   0xf   : > { %s2657_s14 = scalar_lea.vmem %s2912_s0, %s2324_s29 }
  0x10   : > { %v442_v6 = vld [vmem:[%s2657_s14] sm:$0xff]  ;;  %v2666_v7 = vld [vmem:[%s2657_s14 + $0x8] sm:$0xff]  ;;  %s2836_s30 = scalar_lea.vmem %s2923_s11, %s2504_s25 }
  0x11   : > { %v447_v8 = vsel %vm446_vm1, %v442_v6, 0.0  ;;  %2370 = vmatmul.mubr.msk.f32.vlgmr.msra.gmra.mrb[0].mxu1 %vm446_vm1, %v442_v6  ;;  %v454_v9 = vsel %vm446_vm1, %v2666_v7, 0.0  ;;  %v558_v15 = vsub.f32 %v442_v6, %v2675_v11  ;;  %v559_v57 = vsub.f32 %v2666_v7, %v2675_v11 }
  0x12   : > { %v448_v10 = vrot.slane %v447_v8, 4  ;;  %v455_v12 = vrot.slane %v454_v9, 4  ;;  %2373 = vmatpush3.msra.mxu1 %v2662_v5  ;;  %2374 = vmatprep.mubr.msk.f32.mxu1 %vm2553_vm0, %v2552_v1  ;;  %v2682_v18 = vpop.eup %2516 }
  0x13   : > { %2397 = vmatprep.subr.mxu1 %v2552_v1  ;;  %v564_v22 = vmul.f32 %v2682_v18, %v558_v15  ;;  %v565_v3 = vmul.f32 %v2682_v18, %v559_v57 }
  0x14   : > { %v449_v13 = vadd.f32 %v448_v10, %v447_v8  ;;  %v456_v14 = vadd.f32 %v455_v12, %v454_v9  ;;  %v2743_v9 = vld [vmem:[%s2918_s6 + $0x28] sm:$0xff] }
  0x15   : > { %v569_v26 = vmul.f32 %v2687_v19, %v564_v22  ;;  %v570_v10 = vmul.f32 %v2687_v19, %v565_v3 }
  0x16   : > { %v457_v16 = vrot.slane %v456_v14, 2  ;;  %v450_v17 = vrot.slane %v449_v13, 2 }
  0x17   : > { %v574_v29 = vadd.f32 %v2693_v23, %v569_v26  ;;  %v575_v12 = vadd.f32 %v2693_v23, %v570_v10 }
  0x18   : > { %v458_v20 = vadd.f32 %v457_v16, %v456_v14  ;;  %v451_v21 = vadd.f32 %v450_v17, %v449_v13  ;;  %v2762_v13 = vld [vmem:[%s2920_s8] sm:$0xff] }
  0x19   : > { %2380 = vmatmul.mubr.msk.f32.vlgmr.msra.gmra.mrb[0].mxu0 %vm446_vm1, %v574_v29  ;;  %v2771_v16 = vld [vmem:[%s2919_s7] ss:$0 sm:$0xff] }
  0x1a   : > { %v459_v24 = vrot.slane %v458_v20, 1  ;;  %v452_v25 = vrot.slane %v451_v21, 1  ;;  %2383 = vmatpush3.msra.mxu0 %v2700_v30  ;;  %2384 = vmatprep.mubr.msk.f32.mxu0 %vm2553_vm0, %v2552_v1 }
  0x1b   : > { %2387 = vmatprep.subr.mxu0 %v2552_v1 }
  0x1c   : > { %v460_v27 = vadd.f32 %v459_v24, %v458_v20  ;;  %v453_v28 = vadd.f32 %v452_v25, %v451_v21 }
  0x1e   : > { %v477_v31 = vmul.f32 0.125, %v460_v27  ;;  %v476_v32 = vmul.f32 0.125, %v453_v28  ;;  %v2776_v28 = vld [vmem:[%s2657_s14 + $0x10] sm:$0xff] }
  0x1f   : > { %v461_v29 = vsel %vm446_vm1, %v2776_v28, 0.0 }
  0x20   : > { %v481_v33 = vsub.f32 %v2666_v7, %v477_v31  ;;  %v480_v34 = vsub.f32 %v442_v6, %v476_v32  ;;  %v462_v31 = vrot.slane %v461_v29, 4 }
  0x21   : > { %2385 = vmatmul.mubr.msk.f32.vlgmr.msra.gmra.mrb[0].mxu0 %vm446_vm1, %v2666_v7 }
  0x22   : > { %v485_v35 = vmul.f32 %v481_v33, %v481_v33  ;;  %v484_v36 = vmul.f32 %v480_v34, %v480_v34  ;;  %2388 = vmatpush3.msra.mxu0 %v2713_v40  ;;  %2389 = vmatprep.mubr.msk.f32.mxu0 %vm2553_vm0, %v2552_v1  ;;  %v463_v32 = vadd.f32 %v462_v31, %v461_v29 }
  0x23   : > { %2392 = vmatprep.subr.mxu0 %v2552_v1 }
  0x24   : > { %v495_v37 = vsel %vm446_vm1, %v485_v35, 0.0  ;;  %v488_v38 = vsel %vm446_vm1, %v484_v36, 0.0 }
  0x25   : > { %v496_v39 = vrot.slane %v495_v37, 4  ;;  %v489_v41 = vrot.slane %v488_v38, 4 }
  0x27   : > { %v497_v42 = vadd.f32 %v496_v39, %v495_v37  ;;  %v490_v43 = vadd.f32 %v489_v41, %v488_v38 }
  0x29   : > { %v498_v44 = vrot.slane %v497_v42, 2  ;;  %v491_v45 = vrot.slane %v490_v43, 2 }
  0x2b   : > { %v499_v46 = vadd.f32 %v498_v44, %v497_v42  ;;  %v492_v47 = vadd.f32 %v491_v45, %v490_v43 }
  0x2d   : > { %v500_v48 = vrot.slane %v499_v46, 1  ;;  %v493_v49 = vrot.slane %v492_v47, 1 }
  0x2f   : > { %v501_v50 = vadd.f32 %v500_v48, %v499_v46  ;;  %v494_v51 = vadd.f32 %v493_v49, %v492_v47 }
  0x31   : > { %v518_v52 = vmul.f32 0.14285715, %v501_v50  ;;  %v517_v53 = vmul.f32 0.14285715, %v494_v51 }
  0x33   : > { %v521_v54 = vadd.f32 1e-05, %v517_v53  ;;  %v522_v55 = vadd.f32 1e-05, %v518_v52 }
  0x35   : > { %2518 = vrsqrt.f32 %v521_v54 }
  0x36   : > { %2520 = vrsqrt.f32 %v522_v55  ;;  %v560_v55 = vsub.f32 %v2776_v28, %v2675_v11 }
  0x3f   : > { %v2519_v56 = vpop.eup %2518 }
  0x40   : > { %v2521_v59 = vpop.eup %2520  ;;  %v529_v60 = vmul.f32 %v2519_v56, %v480_v34 }
  0x41   : > { %v530_v62 = vmul.f32 %v2521_v59, %v481_v33  ;;  %v464_v33 = vrot.slane %v463_v32, 2  ;;  %v566_v59 = vmul.f32 %v2682_v18, %v560_v55 }
  0x42   : > { %v540_v63 = vmul.f32 %v2726_v58, %v529_v60 }
  0x43   : > { %v541_v2 = vmul.f32 %v2726_v58, %v530_v62  ;;  %v465_v34 = vadd.f32 %v464_v33, %v463_v32  ;;  %v571_v60 = vmul.f32 %v2687_v19, %v566_v59 }
  0x44   : > { %v551_v6 = vadd.f32 %v2731_v61, %v540_v63  ;;  %v2830_v63 = vld [vmem:[%s2921_s9] ss:$0 sm:$0xff] }
  0x45   : > { %v2738_v8 = vadd.f32 %v2731_v61, %v541_v2  ;;  %v466_v35 = vrot.slane %v465_v34, 1  ;;  %v576_v62 = vadd.f32 %v2693_v23, %v571_v60 }
  0x46   : > { %2375 = vmatmul.mubr.msk.f32.vlgmr.msra.gmra.mrb[0].mxu1 %vm446_vm1, %v551_v6 }
  0x47   : > { %2390 = vmatmul.mubr.msk.f32.vlgmr.msra.gmra.mrb[0].mxu0 %vm446_vm1, %v2738_v8  ;;  %2399 = vmatprep.mubr.msk.f32.mxu1 %vm2553_vm0, %v2552_v1  ;;  %v467_v36 = vadd.f32 %v466_v35, %v465_v34 }
  0x48   : > { %2393 = vmatpush3.msra.mxu0 %v2743_v9  ;;  %2394 = vmatprep.mubr.msk.f32.mxu0 %vm2553_vm0, %v2552_v1 }
  0x49   : > { %2432 = vmatprep.subr.mxu0 %v2552_v1  ;;  %2398 = vmatpush3.msra.mxu1 %v2762_v13  ;;  %v478_v37 = vmul.f32 0.125, %v467_v36 }
  0x4a   : > { %2402 = vmatprep.subr.mxu1 %v2552_v1 }
  0x4b   : > { %v482_v38 = vsub.f32 %v2776_v28, %v478_v37 }
  0x4d   : > { %v486_v39 = vmul.f32 %v482_v38, %v482_v38 }
  0x4f   : > { %2395 = vmatmul.mubr.msk.f32.vlgmr.msra.gmra.mrb[0].mxu0 %vm446_vm1, %v575_v12  ;;  %v502_v41 = vsel %vm446_vm1, %v486_v39, 0.0 }
  0x50   : > { %2434 = vmatprep.mubr.msk.f32.mxu0 %vm2553_vm0, %v2552_v1  ;;  %2433 = vmatpush3.msra.mxu0 %v2762_v13  ;;  %v503_v42 = vrot.slane %v502_v41, 4 }
  0x51   : > { %2437 = vmatprep.subr.mxu0 %v2552_v1 }
  0x52   : > { %v504_v43 = vadd.f32 %v503_v42, %v502_v41 }
  0x54   : > { %v505_v44 = vrot.slane %v504_v43, 2 }
  0x56   : > { %v506_v45 = vadd.f32 %v505_v44, %v504_v43 }
  0x58   : > { %v507_v46 = vrot.slane %v506_v45, 1 }
  0x5a   : > { %v508_v50 = vadd.f32 %v507_v46, %v506_v45 }
  0x5c   : > { %v519_v51 = vmul.f32 0.14285715, %v508_v50 }
  0x5e   : > { %v523_v52 = vadd.f32 1e-05, %v519_v51 }
 0x119   : > { %v742_v14 = vpop.f32.mrb[0].mxu1 }
 0x11a   : > { %v2376_v15 = vpop.f32.mrb[1].mxu1  ;;  %v2472_v17 = vadd.f32 %v2771_v16, %v742_v14 }
 0x122   : > { %v1038_v20 = vpop.f32.mrb[0].mxu0 }
 0x123   : > { %v2473_v21 = vadd.f32 %v2472_v17, %v1038_v20  ;;  %v2396_v22 = vpop.f32.mrb[1].mxu0 }
 0x125   : > { %v2302_v24 = vmul.f32 -1.442695, %v2473_v21 }
 0x127   : > { %2522 = vpow2.f32 %v2302_v24 }
 0x131   : > { %v2523_v25 = vpop.eup %2522 }
 0x132   : > { %v1047_v26 = vadd.f32 1.0, %v2523_v25 }
 0x134   : > { %2524 = vrcp.f32 %v1047_v26 }
 0x135   : > { %2526 = vtanh.f32 %v2473_v21  ;;  %v2844_v21 = vld [vmem:[%s2657_s14 + $0x18] sm:$0xff]  ;;  %s2288_s14 = sshll.u32 %s2926_s22, 3 }
 0x136   : > { %2528 = vrsqrt.f32 %v523_v52  ;;  %v468_v22 = vsel %vm446_vm1, %v2844_v21, 0.0  ;;  %s432_s16 = scalar_lea.vmem %s2922_s10, %s2288_s14  ;;  %s441_s19 = scalar_lea.vmem %s2924_s12, %s2288_s14 }
 0x137   : > { %v2176_v59 = vld [vmem:[%s432_s16] sm:$0xff] }
 0x13e   : > { %v2525_v27 = vpop.eup %2524 }
 0x13f   : > { %1051 = vrot.lane.b32.xlu0 %v2525_v27, %s2554_s24  ;;  %v2527_v47 = vpop.eup %2526 }
 0x140   : > { %v2529_v53 = vpop.eup %2528 }
 0x141   : > { %v531_v54 = vmul.f32 %v2529_v53, %v482_v38 }
 0x143   : > { %v542_v56 = vmul.f32 %v2726_v58, %v531_v54 }
 0x145   : > { %v553_v57 = vadd.f32 %v2731_v61, %v542_v56 }
 0x1b1   : > { %v1052_v48 = vpop.permute.xlu0 %1051 }
 0x1b2   : > { %v1054_v49 = vmul.f32 %v2527_v47, %v1052_v48  ;;  %v561_v47 = vsub.f32 %v2844_v21, %v2675_v11 }
 0x1b4   : > { %2400 = vmatmul.mubr.msk.f32.vlgmr.msra.gmra.mrb[2].mxu1 %vm446_vm1, %v1054_v49 }
 0x1b5   : > { %2403 = vmatpush3.msra.mxu1 %v2646_v4  ;;  %2404 = vmatprep.mubr.msk.f32.mxu1 %vm2553_vm0, %v2552_v1 }
 0x1b6   : > { %2407 = vmatprep.subr.mxu1 %v2552_v1 }
 0x1b8   : > { %2405 = vmatmul.mubr.msk.f32.vlgmr.msra.gmra.mrb[4].mxu1 %vm446_vm1, %v2666_v7 }
 0x1b9   : > { %2408 = vmatpush3.msra.mxu1 %v2662_v5  ;;  %2409 = vmatprep.mubr.msk.f32.mxu1 %vm2553_vm0, %v2552_v1 }
 0x1ba   : > { %2412 = vmatprep.subr.mxu1 %v2552_v1 }
 0x1c0   : > { %2410 = vmatmul.mubr.msk.f32.vlgmr.msra.gmra.mrb[4].mxu1 %vm446_vm1, %v2738_v8 }
 0x1c1   : > { %2413 = vmatpush3.msra.mxu1 %v2631_v0  ;;  %2414 = vmatprep.mubr.msk.f32.mxu1 %vm2553_vm0, %v2552_v1 }
 0x1c2   : > { %2417 = vmatprep.subr.mxu1 %v2552_v1 }
 0x1c8   : > { %2415 = vmatmul.mubr.msk.f32.vlgmr.msra.gmra.mrb[4].mxu1 %vm446_vm1, %v575_v12 }
 0x1c9   : > { %2418 = vmatpush3.msra.mxu1 %v2700_v30  ;;  %2419 = vmatprep.mubr.msk.f32.mxu1 %vm2553_vm0, %v2552_v1 }
 0x1ca   : > { %2422 = vmatprep.subr.mxu1 %v2552_v1 }
 0x1d0   : > { %2420 = vmatmul.mubr.msk.f32.vlgmr.msra.gmra.mrb[4].mxu1 %vm446_vm1, %v2776_v28 }
 0x1d1   : > { %2423 = vmatpush3.msra.mxu1 %v2713_v40  ;;  %2424 = vmatprep.mubr.msk.f32.mxu1 %vm2553_vm0, %v2552_v1 }
 0x1d2   : > { %2427 = vmatprep.subr.mxu1 %v2552_v1 }
 0x1d8   : > { %2425 = vmatmul.mubr.msk.f32.vlgmr.msra.gmra.mrb[4].mxu1 %vm446_vm1, %v553_v57 }
 0x1d9   : > { %2428 = vmatpush3.msra.mxu1 %v2743_v9  ;;  %2429 = vmatprep.mubr.msk.f32.mxu1 %vm2553_vm0, %v2552_v1 }
 0x1da   : > { %2467 = vmatprep.subr.mxu1 %v2552_v1 }
 0x1e0   : > { %2430 = vmatmul.mubr.msk.f32.vlgmr.msra.gmra.mrb[4].mxu1 %vm446_vm1, %v576_v62 }
 0x1e1   : > { %2468 = vmatpush3.msra.mxu1 %v2762_v13  ;;  %2469 = vmatprep.mubr.msk.f32.mxu1 %vm2553_vm0, %v2552_v1 }
 0x287   : > { %v1124_v2 = vpop.f32.mrb[2].mxu1 }
 0x288   : > { %v1125_v3 = vadd.f32 %v2830_v63, %v1124_v2  ;;  %v2401_v6 = vpop.f32.mrb[3].mxu1 }
 0x28a   : > { %v1128_v8 = vadd.f32 %v1125_v3, %v2666_v7  ;;  %v469_v7 = vrot.slane %v468_v22, 4 }
 0x28c   : > { %1129 = vst.msk [vmem:[%s2836_s30] sm:$0xff] %vm446_vm1, %v1128_v8  ;;  %v470_v24 = vadd.f32 %v469_v7, %v468_v22 }
 0x28e   : > { %v471_v25 = vrot.slane %v470_v24, 2 }
 0x290   : > { %v472_v26 = vadd.f32 %v471_v25, %v470_v24 }
 0x292   : > { %v473_v27 = vrot.slane %v472_v26, 1 }
 0x294   : > { %v474_v29 = vadd.f32 %v473_v27, %v472_v26 }
 0x296   : > { %v479_v31 = vmul.f32 0.125, %v474_v29 }
 0x298   : > { %v483_v32 = vsub.f32 %v2844_v21, %v479_v31 }
 0x29a   : > { %v487_v33 = vmul.f32 %v483_v32, %v483_v32 }
 0x29c   : > { %v509_v34 = vsel %vm446_vm1, %v487_v33, 0.0 }
 0x29d   : > { %v510_v35 = vrot.slane %v509_v34, 4 }
 0x29f   : > { %v511_v36 = vadd.f32 %v510_v35, %v509_v34 }
 0x2a1   : > { %v512_v37 = vrot.slane %v511_v36, 2 }
 0x2a3   : > { %v513_v38 = vadd.f32 %v512_v37, %v511_v36 }
 0x2a5   : > { %v514_v39 = vrot.slane %v513_v38, 1 }
 0x2a7   : > { %v515_v44 = vadd.f32 %v514_v39, %v513_v38 }
 0x2a9   : > { %v520_v45 = vmul.f32 0.14285715, %v515_v44 }
 0x2ab   : > { %v524_v46 = vadd.f32 1e-05, %v520_v45 }
 0x2b3   : > { %v1560_v10 = vpop.f32.mrb[4].mxu1 }
 0x2b4   : > { %v2474_v12 = vadd.f32 %v2771_v16, %v1560_v10  ;;  %v2431_v13 = vpop.f32.mrb[5].mxu1 }
 0x2b6   : > { %v2310_v14 = vmul.f32 -1.442695, %v2474_v12 }
 0x2b8   : > { %2530 = vpow2.f32 %v2310_v14 }
 0x2c2   : > { %v2531_v15 = vpop.eup %2530 }
 0x2c3   : > { %v1569_v17 = vadd.f32 1.0, %v2531_v15 }
 0x2c5   : > { %2532 = vrcp.f32 %v1569_v17 }
 0x2c6   : > { %2534 = vtanh.f32 %v2474_v12 }
 0x2c7   : > { %2536 = vrsqrt.f32 %v524_v46 }
 0x2cf   : > { %v2533_v20 = vpop.eup %2532 }
 0x2d0   : > { %1573 = vrot.lane.b32.xlu0 %v2533_v20, %s2554_s24  ;;  %v2535_v41 = vpop.eup %2534 }
 0x342   : > { %v1574_v42 = vpop.permute.xlu0 %1573 }
 0x343   : > { %v1576_v43 = vmul.f32 %v2535_v41, %v1574_v42 }
 0x345   : > { %2435 = vmatmul.mubr.msk.f32.vlgmr.msra.gmra.mrb[2].mxu0 %vm446_vm1, %v1576_v43 }
 0x346   : > { %2438 = vmatpush3.msra.mxu0 %v2646_v4  ;;  %2439 = vmatprep.mubr.msk.f32.mxu0 %vm2553_vm0, %v2552_v1  ;;  %v2537_v4 = vpop.eup %2536 }
 0x347   : > { %2442 = vmatprep.subr.mxu0 %v2552_v1 }
 0x349   : > { %2440 = vmatmul.mubr.msk.f32.vlgmr.msra.gmra.mrb[4].mxu0 %vm446_vm1, %v2776_v28 }
 0x34a   : > { %2443 = vmatpush3.msra.mxu0 %v2662_v5  ;;  %2444 = vmatprep.mubr.msk.f32.mxu0 %vm2553_vm0, %v2552_v1  ;;  %v532_v5 = vmul.f32 %v2537_v4, %v483_v32 }
 0x34b   : > { %2447 = vmatprep.subr.mxu0 %v2552_v1 }
 0x351   : > { %2445 = vmatmul.mubr.msk.f32.vlgmr.msra.gmra.mrb[4].mxu0 %vm446_vm1, %v553_v57 }
 0x352   : > { %2448 = vmatpush3.msra.mxu0 %v2631_v0  ;;  %2449 = vmatprep.mubr.msk.f32.mxu0 %vm2553_vm0, %v2552_v1  ;;  %v543_v0 = vmul.f32 %v2726_v58, %v532_v5 }
 0x353   : > { %2452 = vmatprep.subr.mxu0 %v2552_v1 }
 0x354   : > { %v554_v48 = vadd.f32 %v2731_v61, %v543_v0 }
 0x359   : > { %2450 = vmatmul.mubr.msk.f32.vlgmr.msra.gmra.mrb[4].mxu0 %vm446_vm1, %v576_v62 }
 0x35a   : > { %2453 = vmatpush3.msra.mxu0 %v2700_v30  ;;  %2454 = vmatprep.mubr.msk.f32.mxu0 %vm2553_vm0, %v2552_v1  ;;  %v567_v30 = vmul.f32 %v2682_v18, %v561_v47 }
 0x35b   : > { %2457 = vmatprep.subr.mxu0 %v2552_v1 }
 0x35c   : > { %v572_v11 = vmul.f32 %v2687_v19, %v567_v30 }
 0x361   : > { %2455 = vmatmul.mubr.msk.f32.vlgmr.msra.gmra.mrb[4].mxu0 %vm446_vm1, %v2844_v21 }
 0x362   : > { %2458 = vmatpush3.msra.mxu0 %v2713_v40  ;;  %2459 = vmatprep.mubr.msk.f32.mxu0 %vm2553_vm0, %v2552_v1  ;;  %v577_v40 = vadd.f32 %v2693_v23, %v572_v11 }
 0x363   : > { %2462 = vmatprep.subr.mxu0 %v2552_v1 }
 0x369   : > { %2460 = vmatmul.mubr.msk.f32.vlgmr.msra.gmra.mrb[4].mxu0 %vm446_vm1, %v554_v48 }
 0x36a   : > { %2463 = vmatpush3.msra.mxu0 %v2743_v9  ;;  %2464 = vmatprep.mubr.msk.f32.mxu0 %vm2553_vm0, %v2552_v1 }
 0x371   : > { %2465 = vmatmul.mubr.msk.f32.vlgmr.msra.gmra.mrb[4].mxu0 %vm446_vm1, %v577_v40 }
 0x418   : > { %v1646_v58 = vpop.f32.mrb[2].mxu0 }
 0x419   : > { %v1647_v49 = vadd.f32 %v2830_v63, %v1646_v58  ;;  %v2436_v50 = vpop.f32.mrb[3].mxu0 }
 0x41b   : > { %v1650_v18 = vadd.f32 %v1647_v49, %v2776_v28 }
 0x41d   : > { %2312 = vst.msk [vmem:[%s2836_s30 + $0x8] sm:$0xff] %vm446_vm1, %v1650_v18 }
 0x444   : > { %v2083_v61 = vpop.f32.mrb[4].mxu0 }
 0x445   : > { %v2475_v19 = vadd.f32 %v2771_v16, %v2083_v61  ;;  %v2466_v51 = vpop.f32.mrb[5].mxu0 }
 0x447   : > { %v2319_v9 = vmul.f32 -1.442695, %v2475_v19 }
 0x449   : > { %2538 = vpow2.f32 %v2319_v9 }
 0x453   : > { %v2539_v1 = vpop.eup %2538 }
 0x454   : > { %v2092_v23 = vadd.f32 1.0, %v2539_v1 }
 0x456   : > { %2540 = vrcp.f32 %v2092_v23 }
 0x457   : > { %2542 = vtanh.f32 %v2475_v19 }
 0x460   : > { %v2541_v52 = vpop.eup %2540 }
 0x461   : > { %2096 = vrot.lane.b32.xlu1 %v2541_v52, %s2554_s24  ;;  %v2543_v53 = vpop.eup %2542 }
 0x4d3   : > { %v2097_v54 = vpop.permute.xlu1 %2096 }
 0x4d4   : > { %v2099_v28 = vmul.f32 %v2543_v53, %v2097_v54 }
 0x4d6   : > { %2470 = vmatmul.mubr.msk.f32.vlgmr.msra.gmra.mrb[6].mxu1 %vm446_vm1, %v2099_v28 }
 0x5a9   : > { %v2169_v55 = vpop.f32.mrb[6].mxu1 }
 0x5aa   : > { %v2170_v16 = vadd.f32 %v2830_v63, %v2169_v55  ;;  %v2471_v56 = vpop.f32.mrb[7].mxu1 }
 0x5ac   : > { %v2173_v57 = vadd.f32 %v2170_v16, %v2844_v21  ;;  %2178 = vrot.lane.b32.xlu1 %v2170_v16, %s2554_s24 }
 0x5ae   : > { %2321 = vst.msk [vmem:[%s2836_s30 + $0x10] sm:$0xff] %vm446_vm1, %v2173_v57 }
 0x61e   : > { %v2179_v60 = vpop.permute.xlu1 %2178 }
 0x61f   : > { %v2181_v62 = vadd.f32 %v2179_v60, %v2176_v59 }
 0x621   : > { %2182 = vst.msk [vmem:[%s441_s19] sm:$0xff] %vm446_vm1, %v2181_v62 }
 0x622 PF: > { %s23_s21 = sadd.s32 1, %s2550_s21  }
 0x623   : > { %p20_p4 = scmp.ge.s32.totalorder %s23_s21, 4  }
 0x625   :  { %22 = sbr.rel (!%p20_p4) target bundleno = 1 (0x1), region = 112 }

// kernel: stnorm_forward.10
= control target key start
LH: loop header
LB: loop body
LE: loop exit
PB: predicated region body
PF: predicated region fallthrough
CT: control target
= control target key end

     0   :  { %s1667_s0 = inlined_call_operand.vmem [shape: f32[2,3,8,8], index: 0, kind: input, shape index: {}]   ;;  %s1668_s1 = inlined_call_operand.vmem [shape: f32[2,8,8], index: 1, kind: input, shape index: {}]   ;;  %s1669_s2 = inlined_call_operand.vmem [shape: f32[1,8], index: 2, kind: input, shape index: {}]   ;;  %s1670_s3 = inlined_call_operand.vmem [shape: f32[1,8], index: 3, kind: input, shape index: {}]   ;;  %s1671_s4 = inlined_call_operand.vmem [shape: f32[8,8], index: 4, kind: input, shape index: {}]   ;;  %s1672_s5 = inlined_call_operand.vmem [shape: f32[8,8], index: 5, kind: input, shape index: {}]   ;;  %s1673_s6 = inlined_call_operand.vmem [shape: f32[2,24,16], index: 6, kind: input, shape index: {}]   ;;  %s1674_s7 = inlined_call_operand.vmem [shape: f32[1,16], index: 7, kind: input, shape index: {}]   ;;  %s1675_s8 = inlined_call_operand.vmem [shape: f32[8,16], index: 8, kind: input, shape index: {}]   ;;  %s1676_s9 = inlined_call_operand.vmem [shape: f32[1,16], index: 9, kind: input, shape index: {}]   ;;  %s1677_s10 = inlined_call_operand.vmem [shape: f32[2,8,8], index: 10, kind: input, shape index: {}, may-alias: {10,12}]   ;;  %s1678_s11 = inlined_call_operand.hbm [shape: f32[2,1,8,8], index: 11, kind: output, shape index: {0}]   ;;  %s1679_s12 = inlined_call_operand.vmem [shape: f32[2,8,8], index: 12, kind: output, shape index: {1}, may-alias: {10,12}]  }
   0x1   :  { %1680 = sst [smem:[#allocation5_spill]] %s1667_s0 }
   0x2   :  { %1681 = sst [smem:[#allocation6_spill]] %s1668_s1 }
   0x3   :  { %1682 = sst [smem:[#allocation7_spill]] %s1669_s2 }
   0x4   :  { %18 = vsyncpa [#allocation3], 0 }
   0x5   :  { %20 = vsyncpa [#allocation3 + $0x1], 0  ;;  %s1467_s21 = smov 0   ;;  %s1469_s22 = smov 0  }
   0x6   :  { %s1471_s23 = smov 0   ;;  %s1473_s24 = smov 0  }
   0x7 LB: > { %s1488_s25 = sadd.s32 4294967295, %s1396_s24   ;;  %s1195_s26 = sadd.s32 4294967294, %s1396_s24   ;;  %s1396_s24 = sphi %s1473_s24, %s1691_s24   ;;  %s1392_s23 = sphi %s1471_s23, %s1690_s23   ;;  %s1388_s22 = sphi %s1469_s22, %s1689_s22   ;;  %s1384_s21 = sphi %s1467_s21, %s1688_s21  }
   0x8   : > { %s1492_s27 = sadd.s32 1, %s1396_s24   ;;  %s274_s28 = sadd.s32 1, %s1392_s23 }
   0x9   : > { %s271_s29 = ssub.s32 %s1396_s24, %s1492_s27  ;;  %p284_p0 = scmp.ne.s32.totalorder %s1392_s23, %s1388_s22 }
   0xa   : > { %p272_p1 = scmp.eq.s32.totalorder %s271_s29, 0  ;;  %p285_p2 = scmp.eq.s32.totalorder %s1488_s25, 1 }
   0xb   : > { %p290_p3 = scmp.ne.s32.totalorder %s1388_s22, %s1384_s21  ;;  %p291_p4 = scmp.eq.s32.totalorder %s1195_s26, 1 }
   0xc   : > { %s1503_s30 = scalar_select %p272_p1, %s1392_s23, %s274_s28  }
   0xd   : > { %p1505_p5 = por %p285_p2, %p284_p0  ;;  %p1509_p6 = por %p291_p4, %p290_p3 }
   0xe   : > { %p1198_p7 = scmp.ge.s32.totalorder %s1396_s24, 1  ;;  %p377_p8 = scmp.lt.s32.totalorder %s1396_s24, 3 }
  0x10   : > { %p378_p9 = pnand %p1198_p7, %p377_p8 }
  0x11   : > { %v522_v0 = vld [vmem:[%s1673_s6 + $0x10] sm:$0xff] (!%p378_p9)  ;;  %p427_p10 = scmp.lt.s32.totalorder (!%p378_p9), %s1488_s25, 1  ;;  %v1398_v1 = vmov (!%p378_p9), 0.0   ;;  %vm1399_vm0 = vmmov (!%p378_p9), 0   ;;  %s1685_s1 = sld [smem:[#allocation6_spill]] (!%p378_p9)  ;;  %v520_v4 = vld [vmem:[%s1673_s6] sm:$0xff] (!%p378_p9) }
  0x12   : > { %381 = sbr.rel (%p378_p9) target bundleno = 781 (0x30d), region = 64  ;;  %1244 = vmatprep.subr.mxu0 (!%p378_p9), %v1398_v1  ;;  %1246 = vmatprep.mubr.msk.f32.mxu0 (!%p378_p9), %vm1399_vm0, %v1398_v1  ;;  %vm442_vm1 = vcmask (!%p378_p9), 64512   ;;  %s1686_s0 = sld [smem:[#allocation5_spill]] (!%p378_p9)  ;;  %v521_v5 = vld [vmem:[%s1673_s6 + $0x8] sm:$0xff] (!%p378_p9)  ;;  %v514_v19 = vld [vmem:[%s1671_s4] sm:$0xff] (!%p378_p9)  ;;  %v523_v28 = vld [vmem:[%s1673_s6 + $0x18] sm:$0xff] (!%p378_p9) }
  0x13   : > { %1245 = vmatpush3.msra.mxu0 (!%p378_p9), %v522_v0  ;;  %1234 = vmatprep.subr.mxu1 (!%p378_p9), %v1398_v1  ;;  %v517_v23 = vld [vmem:[%s1672_s5] sm:$0xff] (!%p378_p9)  ;;  %s1687_s2 = sld [smem:[#allocation7_spill]] (!%p378_p9)  ;;  %s1400_s15 = smov (!%p378_p9), 120  }
  0x14   : > { %1249 = vmatprep.subr.mxu0 (!%p378_p9), %v1398_v1  ;;  %1235 = vmatpush3.msra.mxu1 (!%p378_p9), %v520_v4  ;;  %v524_v38 = vld [vmem:[%s1673_s6 + $0x20] sm:$0xff] (!%p378_p9)  ;;  %v525_v4 = vld [vmem:[%s1673_s6 + $0x28] sm:$0xff] (!%p378_p9)  ;;  %s1217_s26 = sshll.u32 (!%p378_p9), %s1488_s25, 7  ;;  %s1401_s18 = smov (!%p378_p9), [#allocation2]  }
  0x15   : > { %1236 = vmatprep.mubr.msk.f32.mxu1 (!%p378_p9), %vm1399_vm0, %v1398_v1  ;;  %1239 = vmatprep.subr.mxu1 (!%p378_p9), %v1398_v1  ;;  %v1204_v62 = vld [vmem:[%s1670_s3] ss:$0 sm:$0xff] (!%p378_p9) }
  0x17   : > { %v1205_v2 = vld [vmem:[%s1685_s1 + $0x8] sm:$0xff] (!%p378_p9)  ;;  %v1549_v9 = vld [vmem:[%s1685_s1] sm:$0xff] (!%p378_p9) }
  0x18   : > { %v510_v3 = vadd.f32 (!%p378_p9), 1e-05, %v1205_v2 }
  0x19   : > { %s1526_s19 = scalar_select %p427_p10, %s1488_s25, 1  ;;  %v1203_v58 = vld [vmem:[%s1687_s2] ss:$0 sm:$0xff] }
  0x1a   : > { %1322 = vrsqrt.f32 %v510_v3  ;;  %s1616_s2 = scalar_lea.hbm %s1678_s11, %s1217_s26 }
  0x1b   : > { %s1279_s28 = smul.u32 24, %s1526_s19 }
  0x1d   : > { %s431_s16 = scalar_lea.vmem %s1686_s0, %s1279_s28 }
  0x1e   : > { %v440_v6 = vld [vmem:[%s431_s16] sm:$0xff]  ;;  %v1543_v7 = vld [vmem:[%s431_s16 + $0x10] sm:$0xff]  ;;  %s418_s16 = sand.u32 1, %s1388_s22  }
  0x1f   : > { %v443_v8 = vsel %vm442_vm1, %v440_v6, 0.0  ;;  %1237 = vmatmul.mubr.msk.f32.vlgmr.msra.gmra.mrb[0].mxu1 %vm442_vm1, %v440_v6  ;;  %v450_v10 = vsel %vm442_vm1, %v1543_v7, 0.0  ;;  %v508_v14 = vsub.f32 %v440_v6, %v1549_v9  ;;  %v509_v56 = vsub.f32 %v1543_v7, %v1549_v9  ;;  %v526_v9 = vld [vmem:[%s1675_s8] sm:$0xff]  ;;  %s1199_s17 = sshll.u32 %s418_s16, 3  ;;  %s1080_s25 = scalar_lea.sflag [#allocation3], %s418_s16 }
  0x20   : > { %v444_v11 = vrot.slane %v443_v8, 4  ;;  %v451_v12 = vrot.slane %v450_v10, 4  ;;  %1240 = vmatpush3.msra.mxu1 %v521_v5  ;;  %1241 = vmatprep.mubr.msk.f32.mxu1 %vm1399_vm0, %v1398_v1  ;;  %s420_s28 = scalar_lea.vmem [#allocation2], %s1199_s17 }
  0x21   : > { %1264 = vmatprep.subr.mxu1 %v1398_v1  ;;  %s1097_s29 = sshll.u32 %s420_s28, 4  ;;  %s1618_s29 = int_to_ptr.vmem [resolvable:$true] %s1097_s29 }
  0x22   : > { %v445_v13 = vadd.f32 %v444_v11, %v443_v8  ;;  %v452_v15 = vadd.f32 %v451_v12, %v450_v10  ;;  %v1206_v12 = vld [vmem:[%s1674_s7] ss:$0 sm:$0xff]  ;;  %s1334_s17 = scalar_lea.vmem %s1618_s29, 128 }
  0x23   : > { %p1335_p11 = scmp.ne.s32.totalorder %s1618_s29, %s1334_s17 }
  0x24   : > { %v453_v16 = vrot.slane %v452_v15, 2  ;;  %v446_v17 = vrot.slane %v445_v13, 2  ;;  %v1323_v18 = vpop.eup %1322 }
  0x25   : > { %v512_v20 = vmul.f32 %v1323_v18, %v508_v14  ;;  %v513_v63 = vmul.f32 %v1323_v18, %v509_v56  ;;  %p1336_p12 = pnand %p1335_p11, %p1505_p5 }
  0x26   : > { %v454_v21 = vadd.f32 %v453_v16, %v452_v15  ;;  %v447_v22 = vadd.f32 %v446_v17, %v445_v13 }
  0x27   : > { %v515_v24 = vmul.f32 %v514_v19, %v512_v20  ;;  %p1337_p13 = pneg %p1336_p12 }
  0x28   : > { %v455_v25 = vrot.slane %v454_v21, 1  ;;  %v448_v26 = vrot.slane %v447_v22, 1 }
  0x29   : > { %v518_v27 = vadd.f32 %v517_v23, %v515_v24 }
  0x2a   : > { %v456_v29 = vadd.f32 %v455_v25, %v454_v21  ;;  %v449_v30 = vadd.f32 %v448_v26, %v447_v22 }
  0x2b   : > { %1247 = vmatmul.mubr.msk.f32.vlgmr.msra.gmra.mrb[0].mxu0 %vm442_vm1, %v518_v27 }
  0x2c   : > { %v459_v31 = vmul.f32 0.125, %v456_v29  ;;  %v458_v32 = vmul.f32 0.125, %v449_v30  ;;  %1250 = vmatpush3.msra.mxu0 %v523_v28  ;;  %1251 = vmatprep.mubr.msk.f32.mxu0 %vm1399_vm0, %v1398_v1 }
  0x2d   : > { %1254 = vmatprep.subr.mxu0 %v1398_v1 }
  0x2e   : > { %v461_v33 = vsub.f32 %v1543_v7, %v459_v31  ;;  %v460_v34 = vsub.f32 %v440_v6, %v458_v32  ;;  %v516_v6 = vmul.f32 %v514_v19, %v513_v63 }
  0x30   : > { %v463_v35 = vmul.f32 %v461_v33, %v461_v33  ;;  %v462_v36 = vmul.f32 %v460_v34, %v460_v34  ;;  %v519_v8 = vadd.f32 %v517_v23, %v516_v6  ;;  %v1207_v23 = vld [vmem:[%s1676_s9] ss:$0 sm:$0xff] }
  0x32   : > { %v471_v37 = vsel %vm442_vm1, %v463_v35, 0.0  ;;  %v464_v39 = vsel %vm442_vm1, %v462_v36, 0.0 }
  0x33   : > { %v472_v40 = vrot.slane %v471_v37, 4  ;;  %v465_v41 = vrot.slane %v464_v39, 4  ;;  %1252 = vmatmul.mubr.msk.f32.vlgmr.msra.gmra.mrb[0].mxu0 %vm442_vm1, %v1543_v7 }
  0x34   : > { %1255 = vmatpush3.msra.mxu0 %v524_v38  ;;  %1256 = vmatprep.mubr.msk.f32.mxu0 %vm1399_vm0, %v1398_v1 }
  0x35   : > { %v473_v42 = vadd.f32 %v472_v40, %v471_v37  ;;  %v466_v43 = vadd.f32 %v465_v41, %v464_v39  ;;  %1259 = vmatprep.subr.mxu0 %v1398_v1 }
  0x37   : > { %v474_v44 = vrot.slane %v473_v42, 2  ;;  %v467_v45 = vrot.slane %v466_v43, 2 }
  0x39   : > { %v475_v46 = vadd.f32 %v474_v44, %v473_v42  ;;  %v468_v47 = vadd.f32 %v467_v45, %v466_v43 }
  0x3b   : > { %v476_v48 = vrot.slane %v475_v46, 1  ;;  %v469_v49 = vrot.slane %v468_v47, 1 }
  0x3d   : > { %v477_v50 = vadd.f32 %v476_v48, %v475_v46  ;;  %v470_v51 = vadd.f32 %v469_v49, %v468_v47 }
  0x3f   : > { %v480_v52 = vmul.f32 0.14285715, %v477_v50  ;;  %v479_v53 = vmul.f32 0.14285715, %v470_v51 }
  0x41   : > { %v482_v54 = vadd.f32 1e-05, %v480_v52  ;;  %v481_v55 = vadd.f32 1e-05, %v479_v53 }
  0x43   : > { %1324 = vrsqrt.f32 %v482_v54 }
  0x44   : > { %1326 = vrsqrt.f32 %v481_v55 }
  0x4d   : > { %v1325_v57 = vpop.eup %1324 }
  0x4e   : > { %v1327_v59 = vpop.eup %1326  ;;  %v486_v60 = vmul.f32 %v1325_v57, %v461_v33 }
  0x4f   : > { %v485_v61 = vmul.f32 %v1327_v59, %v460_v34 }
  0x50   : > { %v495_v0 = vmul.f32 %v1203_v58, %v486_v60 }
  0x51   : > { %v494_v2 = vmul.f32 %v1203_v58, %v485_v61 }
  0x52   : > { %v504_v3 = vadd.f32 %v1204_v62, %v495_v0 }
  0x53   : > { %v503_v5 = vadd.f32 %v1204_v62, %v494_v2 }
  0x54   : > { %1257 = vmatmul.mubr.msk.f32.vlgmr.msra.gmra.mrb[0].mxu0 %vm442_vm1, %v504_v3 }
  0x55   : > { %1242 = vmatmul.mubr.msk.f32.vlgmr.msra.gmra.mrb[0].mxu1 %vm442_vm1, %v503_v5  ;;  %1260 = vmatpush3.msra.mxu0 %v525_v4 }
  0x56   : > { %1261 = vmatprep.mubr.msk.f32.mxu0 %vm1399_vm0, %v1398_v1  ;;  %1266 = vmatprep.mubr.msk.f32.mxu1 %vm1399_vm0, %v1398_v1 }
  0x57   : > { %1265 = vmatpush3.msra.mxu1 %v526_v9 }
  0x5c   : > { %1262 = vmatmul.mubr.msk.f32.vlgmr.msra.gmra.mrb[0].mxu0 %vm442_vm1, %v519_v8 }
 0x128   : > { %v684_v10 = vpop.f32.mrb[0].mxu1 }
 0x129   : > { %v1243_v11 = vpop.f32.mrb[1].mxu1  ;;  %v1269_v13 = vadd.f32 %v1206_v12, %v684_v10 }
 0x12f   : > { %v980_v14 = vpop.f32.mrb[0].mxu0 }
 0x130   : > { %v1270_v15 = vadd.f32 %v1269_v13, %v980_v14  ;;  %v1263_v16 = vpop.f32.mrb[1].mxu0 }
 0x132   : > { %v1214_v1 = vmul.f32 -1.442695, %v1270_v15 }
 0x134   : > { %1328 = vpow2.f32 %v1214_v1 }
 0x13e   : > { %v1329_v17 = vpop.eup %1328 }
 0x13f   : > { %v989_v18 = vadd.f32 1.0, %v1329_v17 }
 0x141   : > { %1330 = vrcp.f32 %v989_v18 }
 0x142   : > { %1332 = vtanh.f32 %v1270_v15 }
 0x14b   : > { %v1331_v19 = vpop.eup %1330 }
 0x14c   : > { %993 = vrot.lane.b32.xlu0 %v1331_v19, %s1400_s15  ;;  %v1333_v20 = vpop.eup %1332 }
 0x1be   : > { %v994_v21 = vpop.permute.xlu0 %993 }
 0x1bf   : > { %v996_v22 = vmul.f32 %v1333_v20, %v994_v21 }
 0x1c1   : > { %1267 = vmatmul.mubr.msk.f32.vlgmr.msra.gmra.mrb[2].mxu1 %vm442_vm1, %v996_v22 }
 0x294   : > { %v1066_v24 = vpop.f32.mrb[2].mxu1 }
 0x295   : > { %v1067_v25 = vadd.f32 %v1207_v23, %v1066_v24  ;;  %v1268_v26 = vpop.f32.mrb[3].mxu1 }
 0x297   : > { %v1070_v27 = vadd.f32 %v1067_v25, %v1543_v7  ;;  %1074 = vrot.lane.b32.xlu0 %v1067_v25, %s1400_s15  ;;  %s1338_s15 = sshll.u32 %s1401_s18, 4  ;;  %s1339_s15 = int_to_ptr.vmem [resolvable:$false] %s1338_s15 }
 0x298   : > { %s1340_s20 = scalar_lea.vmem %s1339_s15, 256  ;;  %p1341_p0 = scmp.lt.s32.totalorder %s1618_s29, %s1339_s15 }
 0x299   : > { %1071 = vst.msk [vmem:[%s420_s28] sm:$0xff] %vm442_vm1, %v1070_v27  ;;  %p1342_p1 = scmp.lt.s32.totalorder %s1340_s20, %s1334_s17 }
 0x29b   : > { %p1343_p2 = por %p1342_p1, %p1341_p0 }
 0x29d   : > { %p1344_p3 = pnand %p1343_p2, %p1337_p13 }
 0x29f   : > { %1347 = shalt.err (!%p1344_p3)
}
 0x2a0   : > { %s1348_s0 = scalar_lea.hbm %s1616_s2, 128  ;;  %s1352_s26 = scalar_lea.hbm %s1678_s11, 256 }
 0x2a1   : > { %p1349_p4 = scmp.ne.s32.totalorder %s1616_s2, %s1348_s0  ;;  %p1353_p9 = scmp.lt.u32.totalorder %s1616_s2, %s1678_s11 }
 0x2a2   : > { %p1354_p10 = scmp.lt.u32.totalorder %s1352_s26, %s1348_s0  ;;  %p1356_p12 = scmp.lt.u32.totalorder %s1348_s0, %s1616_s2 }
 0x2a3   : > { %p1350_p7 = pnand %p1349_p4, %p1505_p5 }
 0x2a4   : > { %p1355_p11 = por %p1354_p10, %p1353_p9 }
 0x2a5   : > { %p1351_p8 = pneg %p1350_p7 }
 0x2a6   : > { %p1357_p13 = por %p1356_p12, %p1355_p11 }
 0x2a8   : > { %p1358_p0 = pnand %p1357_p13, %p1351_p8 }
 0x2aa   : > { %1361 = shalt.err (!%p1358_p0)
}
 0x2ab   : > { %1280 = dma.vmem_to_hbm [thread:$0]  (%p1505_p5), %s1618_s29, 128, %s1616_s2, %s1080_s25  }
 0x2ac   : > { %s1201_s17 = sshll.u32 %s1526_s19, 3 }
 0x2ad   : > { %s435_s1 = scalar_lea.vmem %s1677_s10, %s1201_s17  ;;  %s439_s26 = scalar_lea.vmem %s1679_s12, %s1201_s17 }
 0x2ae   : > { %v1072_v7 = vld [vmem:[%s435_s1] sm:$0xff] }
 0x309   : > { %v1075_v28 = vpop.permute.xlu0 %1074 }
 0x30a   : > { %v1077_v29 = vadd.f32 %v1075_v28, %v1072_v7 }
 0x30c   : > { %1078 = vst.msk [vmem:[%s439_s26] sm:$0xff] %vm442_vm1, %v1077_v29 }
 0x30d PF: > { %p1286_p1 = scmp.ge.s32.totalorder %s1396_s24, 2  ;;  %s1112_s2 = sand.u32 1, %s1384_s21  }
 0x30e   : > { %s1113_s13 = scalar_lea.sflag [#allocation3], %s1112_s2 }
 0x30f   : > { %p1283_p5 = pnand %p1286_p1, %p1509_p6 }
 0x311   : > { %1379 = dma.done.wait (!%p1283_p5), %s1113_s13, 128  }
 0x312   : > { %1381 = vsyncadd (!%p1283_p5), %s1113_s13, 4294967168  ;;  %p23_p2 = scmp.ge.s32.totalorder %s1492_s27, 4   ;;  %s1688_s21 = smov %s1388_s22 }
 0x313   : > { %s1689_s22 = smov %s1392_s23  ;;  %s1690_s23 = smov %s1503_s30 }
 0x314   : > { %s1691_s24 = smov %s1492_s27  ;;  %25 = sbr.rel (!%p23_p2) target bundleno = 7 (0x7), region = 115 }
 0x31b   :  { %1125 = vsyncpa [#allocation3], 1 }
 0x31c   :  { %1127 = vsyncpa [#allocation3 + $0x1], 1 }

// kernel: stnorm_forward.11
= control target key start
LH: loop header
LB: loop body
LE: loop exit
PB: predicated region body
PF: predicated region fallthrough
CT: control target
= control target key end

     0   :  { %s528_s18 = smov 0   ;;  %s560_s0 = inlined_call_operand.vmem [shape: f32[2,8,8], index: 0, kind: input, shape index: {}]   ;;  %s561_s1 = inlined_call_operand.vmem [shape: f32[8,16], index: 1, kind: input, shape index: {}]   ;;  %s562_s2 = inlined_call_operand.vmem [shape: f32[1,16], index: 2, kind: input, shape index: {}]   ;;  %s563_s3 = inlined_call_operand.vmem [shape: f32[16,4], index: 3, kind: input, shape index: {}]   ;;  %s564_s4 = inlined_call_operand.vmem [shape: f32[1,4], index: 4, kind: input, shape index: {}]   ;;  %s565_s5 = inlined_call_operand.vmem [shape: f32[2,8,4], index: 5, kind: output, shape index: {}]  }
   0x1 LB: > { %s443_s19 = sadd.s32 4294967295, %s493_s18   ;;  %p447_p0 = scmp.ge.s32.totalorder %s493_s18, 1  ;;  %s493_s18 = sphi %s528_s18, %s15_s18  }
   0x2   : > { %p186_p1 = scmp.lt.s32.totalorder %s493_s18, 3 }
   0x4   : > { %p187_p2 = pnand %p447_p0, %p186_p1 }
   0x5   : > { %v222_v0 = vld [vmem:[%s561_s1] sm:$0xff] (!%p187_p2)  ;;  %p212_p3 = scmp.lt.s32.totalorder (!%p187_p2), %s443_s19, 1  ;;  %v495_v1 = vmov (!%p187_p2), 0.0   ;;  %vm496_vm0 = vmmov (!%p187_p2), 0   ;;  %vm230_vm1 = vcmask (!%p187_p2), 64512   ;;  %v306_v5 = vld [vmem:[%s563_s3 + $0x8] sm:$0xff] (!%p187_p2) }
   0x6   : > { %190 = sbr.rel (%p187_p2) target bundleno = 450 (0x1c2), region = 40  ;;  %461 = vmatprep.subr.mxu0 (!%p187_p2), %v495_v1  ;;  %463 = vmatprep.mubr.msk.f32.mxu0 (!%p187_p2), %vm496_vm0, %v495_v1  ;;  %v305_v4 = vld [vmem:[%s563_s3] sm:$0xff] (!%p187_p2)  ;;  %v497_v7 = vmov (!%p187_p2), 0.0|0.0   ;;  %vm314_vm2 = vcmask (!%p187_p2), 130048   ;;  %vm388_vm3 = vcmask (!%p187_p2), 31744  }
   0x7   : > { %462 = vmatpush3.msra.mxu0 (!%p187_p2), %v222_v0  ;;  %470 = vmatprep.mubr.msk.f32.mxu1 (!%p187_p2), %vm496_vm0, %v495_v1  ;;  %v474_v6 = vpack.c.bf16 (!%p187_p2), %v306_v5, %v305_v4  ;;  %v450_v8 = vld [vmem:[%s562_s2] ss:$0 sm:$0xff] (!%p187_p2) }
   0x8   : > { %473 = vmatprep.subr.bf16.mxu1 (!%p187_p2), %v497_v7  ;;  %v452_v13 = vld [vmem:[%s564_s4] ss:$0 sm:$0xff] (!%p187_p2) }
   0x9   : > { %475 = vmatpush3.bf16.msra.mxu1 (!%p187_p2), %v474_v6 }
   0xd   : > { %s567_s19 = smov (!%p212_p3, %s443_s19), 1 }
   0xe   : > { %s448_s22 = sshll.u32 %s567_s19, 3 }
   0xf   : > { %s215_s25 = scalar_lea.vmem %s560_s0, %s448_s22  ;;  %s219_s11 = scalar_lea.vmem %s565_s5, %s448_s22 }
  0x10   : > { %v220_v2 = vld [vmem:[%s215_s25] sm:$0xff] }
  0x11   : > { %v221_v3 = vmax.f32 %v220_v2, 0.0 }
  0x13   : > { %464 = vmatmul.mubr.msk.f32.vlgmr.msra.gmra.mrb[0].mxu0 %vm230_vm1, %v221_v3 }
  0xe6   : > { %v300_v9 = vpop.f32.mrb[0].mxu0 }
  0xe7   : > { %v301_v10 = vadd.f32 %v450_v8, %v300_v9  ;;  %v465_v11 = vpop.f32.mrb[1].mxu0 }
  0xe9   : > { %v304_v12 = vmax.f32 %v301_v10, 0.0 }
  0xeb   : > { %471 = vmatmul.mubr.msk.f32.vlgmr.msra.gmra.mrb[0].mxu1 %vm314_vm2, %v304_v12 }
 0x1be   : > { %v384_v14 = vpop.f32.mrb[0].mxu1 }
 0x1bf   : > { %v385_v15 = vadd.f32 %v452_v13, %v384_v14  ;;  %v472_v16 = vpop.f32.mrb[1].mxu1 }
 0x1c1   : > { %389 = vst.msk [vmem:[%s219_s11] sm:$0xff] %vm388_vm3, %v385_v15 }
 0x1c2 PF: > { %s15_s18 = sadd.s32 1, %s493_s18  }
 0x1c3   : > { %p12_p4 = scmp.ge.s32.totalorder %s15_s18, 4  }
 0x1c5   :  { %14 = sbr.rel (!%p12_p4) target bundleno = 1 (0x1), region = 70 }

</bundles_post_ra>
